<compile_context>
chip_gen: v7x
topology: tpu7x:2x2x1
jax: 0.10.0
libtpu: 0.0.40
codegen_flags: <defaults>
</compile_context>

<pallas_src>
import functools

import jax
import jax.numpy as jnp
from jax.experimental import pallas as pl
from jax.experimental.pallas import tpu as pltpu


def _round_up(x, m):
    return (x + m - 1) // m * m


def _vmem_budget_bytes():
    """Generation-aware VMEM budget (~80% of per-core capacity, capped at 100 MiB)."""
    try:
        cap = int(pltpu.get_tpu_info().vmem_capacity_bytes)
    except Exception:  # conservative fallback (v7x-sized part)
        cap = 64 * 1024 * 1024
    return min(int(cap * 0.8), 100 * 1024 * 1024)


def _apply_layer_norm(y, gamma, beta, eps, d_in_true):
    """LayerNorm over the last dim; statistics use only the first d_in_true columns."""
    d_pad = y.shape[-1]
    inv_n = 1.0 / d_in_true
    mean = jnp.sum(y, axis=-1, keepdims=True) * inv_n
    if d_in_true == d_pad:
        centered = y - mean
    else:
        # Padded feature columns are exactly zero; exclude them from the variance.
        mask = jax.lax.broadcasted_iota(jnp.int32, y.shape, 1) < d_in_true
        centered = jnp.where(mask, y - mean, 0.0)
    var = jnp.sum(centered * centered, axis=-1, keepdims=True) * inv_n
    y = (y - mean) * jax.lax.rsqrt(var + eps)
    return y * gamma.astype(jnp.float32) + beta.astype(jnp.float32)


def _ffn_kernel_resident(x_ref, w1_ref, b1_ref, w2_ref, b2_ref, gamma_ref, beta_ref,
                         o_ref, *, norm, eps, d_in_true):
    """Grid: (row tiles,).  Full W1/W2 stay VMEM-resident via constant index maps."""
    x = x_ref[...]                                         # (tm, d_in_p), native dtype
    h = jnp.dot(x, w1_ref[...], preferred_element_type=jnp.float32)
    h = jnp.maximum(h + b1_ref[...].astype(jnp.float32), 0.0)
    # Mixed precision: post-ReLU activation is cast back to the weight dtype for the MXU
    # (no-op for f32 weights; documented bf16 deviation from a pure-f32 reference).
    y = jnp.dot(h.astype(w2_ref.dtype), w2_ref[...], preferred_element_type=jnp.float32)
    # TODO(synk): dropout is identity (eval mode); training-mode stochastic dropout omitted.
    y = y + b2_ref[...].astype(jnp.float32) + x.astype(jnp.float32)
    if norm:
        y = _apply_layer_norm(y, gamma_ref[...], beta_ref[...], eps, d_in_true)
    o_ref[...] = y.astype(o_ref.dtype)


def _ffn_kernel_ktiled(x_ref, w1_ref, b1_ref, w2_ref, b2_ref, gamma_ref, beta_ref,
                       o_ref, acc_ref, *, norm, eps, d_in_true, n_k):
    """Grid: (row tiles, hidden tiles).  acc_ref accumulates h_k @ W2[k] over hidden tiles."""
    k = pl.program_id(1)

    x = x_ref[...]                                         # (tm, d_in_p), native dtype
    h = jnp.dot(x, w1_ref[...], preferred_element_type=jnp.float32)
    h = jnp.maximum(h + b1_ref[...].astype(jnp.float32), 0.0)
    partial_y = jnp.dot(h.astype(w2_ref.dtype), w2_ref[...],
                        preferred_element_type=jnp.float32)

    # Fused init: the first hidden tile writes its partial product directly (no zero-fill).
    @pl.when(k == 0)
    def _():
        acc_ref[...] = partial_y

    # Middle hidden tiles accumulate.
    @pl.when(jnp.logical_and(k > 0, k < n_k - 1))
    def _():
        acc_ref[...] += partial_y

    # Fused finalize: the last hidden tile consumes acc + partial without re-storing acc.
    @pl.when(k == n_k - 1)
    def _():
        acc = acc_ref[...]
        if n_k > 1:
            acc = acc + partial_y
        # TODO(synk): dropout is identity (eval mode); training-mode stochastic dropout omitted.
        y = acc + b2_ref[...].astype(jnp.float32) + x.astype(jnp.float32)
        if norm:
            y = _apply_layer_norm(y, gamma_ref[...], beta_ref[...], eps, d_in_true)
        o_ref[...] = y.astype(o_ref.dtype)


def _row_tile(tm_req, m_rows, sub):
    """Sublane-aligned row tile clamped to the row count; split into >= 2 tiles when possible
    so the 'parallel' grid axis can shard across both v7x TensorCores."""
    t = _round_up(min(tm_req, _round_up(m_rows, sub)), sub)
    if t >= m_rows and m_rows > sub:
        t = _round_up((m_rows + 1) // 2, sub)
    return t


def _resident_bytes(tm, d_in_p, d_hid_p, itemsize):
    """Conservative VMEM footprint of the weight-resident layout (weights counted as 2 bufs)."""
    xio = 4 * tm * d_in_p * itemsize                       # x + out tiles, double-buffered
    w = 2 * 2 * d_in_p * d_hid_p * itemsize                # W1 + W2 (assume 2 buffers each)
    vec = 2 * (d_hid_p + 3 * d_in_p) * itemsize            # b1, b2, gamma, beta
    h_tmp = tm * d_hid_p * (4 + itemsize)                  # f32 hidden + downcast copy
    y_tmp = 2 * tm * d_in_p * 4                            # f32 residual / LN temporaries
    return xio + w + vec + h_tmp + y_tmp


def _ktiled_bytes(tm, tk, d_in_p, itemsize):
    """Conservative VMEM footprint of the hidden-tiled (reduction grid axis) layout."""
    xio = 4 * tm * d_in_p * itemsize
    w = 2 * 2 * tk * d_in_p * itemsize
    vec = 2 * (tk + 3 * d_in_p) * itemsize
    acc = tm * d_in_p * 4
    h_tmp = tm * tk * (4 + itemsize)
    y_tmp = 2 * tm * d_in_p * 4
    return xio + w + vec + acc + h_tmp + y_tmp


def positionwise_feed_forward(x, w1, b1, w2, b2, gamma=None, beta=None, *,
                              norm=False, eps=1e-6, tm=None, tk=None,
                              weight_resident=None):
    """x: [B, S, d_in]; w1: [d_in, d_hid]; b1: [d_hid]; w2: [d_hid, d_in]; b2: [d_in].

    Weights are stored transposed relative to torch's nn.Linear.weight so the kernel does
    row-major matmuls.  gamma/beta are the LayerNorm affine params (torch default ones/zeros).
    weight_resident=None picks the layout automatically from the VMEM budget.
    """
    B, S, d_in = x.shape
    d_hid = w1.shape[1]
    M = B * S

    itemsize = jnp.dtype(x.dtype).itemsize
    sub = 8 * max(1, 4 // itemsize)                        # sublane multiple for the dtype
    d_in_p = _round_up(d_in, 128)                          # lane-dense feature dim
    d_hid_p = _round_up(d_hid, 128)

    budget = _vmem_budget_bytes()
    big_vmem = budget >= 96 * 1024 * 1024                  # 128-MiB parts (v5e / v6e)

    if gamma is None:
        gamma = jnp.ones((d_in,), x.dtype)
    if beta is None:
        beta = jnp.zeros((d_in,), x.dtype)

    # ---- choose layout & tile sizes --------------------------------------------------------
    tm_res = _row_tile(tm if tm is not None else 512, M, sub)
    use_resident = weight_resident
    if use_resident is None:
        use_resident = _resident_bytes(tm_res, d_in_p, d_hid_p, itemsize) <= budget

    if use_resident:
        tm_eff = tm_res
        tk_eff = d_hid_p
        n_k = 1
    else:
        # Fallback with a hidden reduction axis: bigger row tiles on 128-MiB parts (v6e
        # roofline), then shrink tk first and tm second until the footprint fits the budget
        # (keeps v7x's 64-MiB per-core limit safe for f32 / large d_in configs).
        tm_eff = _row_tile(tm if tm is not None else (1024 if big_vmem else 512), M, sub)
        tk_eff = min(_round_up(tk, 128) if tk is not None else 512, d_hid_p)
        while _ktiled_bytes(tm_eff, tk_eff, d_in_p, itemsize) > budget and tk_eff > 128:
            tk_eff = max(128, (tk_eff // 2) // 128 * 128)
        while _ktiled_bytes(tm_eff, tk_eff, d_in_p, itemsize) > budget and tm_eff > sub:
            tm_eff = max(sub, _round_up(tm_eff // 2, sub))
        d_hid_p = _round_up(d_hid_p, tk_eff)
        n_k = d_hid_p // tk_eff

    M_p = _round_up(M, tm_eff)

    # ---- pad operands to the tiled / lane-dense shapes -------------------------------------
    x2d = jnp.pad(x.reshape(M, d_in), ((0, M_p - M), (0, d_in_p - d_in)))
    w1_p = jnp.pad(w1, ((0, d_in_p - d_in), (0, d_hid_p - d_hid)))
    b1_p = jnp.pad(b1.reshape(1, d_hid), ((0, 0), (0, d_hid_p - d_hid)))
    w2_p = jnp.pad(w2, ((0, d_hid_p - d_hid), (0, d_in_p - d_in)))
    b2_p = jnp.pad(b2.reshape(1, d_in), ((0, 0), (0, d_in_p - d_in)))
    gamma_p = jnp.pad(gamma.reshape(1, d_in), ((0, 0), (0, d_in_p - d_in)))
    beta_p = jnp.pad(beta.reshape(1, d_in), ((0, 0), (0, d_in_p - d_in)))

    if use_resident:
        kernel = functools.partial(_ffn_kernel_resident, norm=norm, eps=eps, d_in_true=d_in)
        grid = (M_p // tm_eff,)
        in_specs = [
            pl.BlockSpec((tm_eff, d_in_p), lambda i: (i, 0)),        # x rows
            pl.BlockSpec((d_in_p, d_hid_p), lambda i: (0, 0)),       # W1 (fetched once)
            pl.BlockSpec((1, d_hid_p), lambda i: (0, 0)),            # b1
            pl.BlockSpec((d_hid_p, d_in_p), lambda i: (0, 0)),       # W2 (fetched once)
            pl.BlockSpec((1, d_in_p), lambda i: (0, 0)),             # b2
            pl.BlockSpec((1, d_in_p), lambda i: (0, 0)),             # gamma
            pl.BlockSpec((1, d_in_p), lambda i: (0, 0)),             # beta
        ]
        out_specs = pl.BlockSpec((tm_eff, d_in_p), lambda i: (i, 0))
        scratch_shapes = []
        dim_sem = ("parallel",)
    else:
        kernel = functools.partial(_ffn_kernel_ktiled, norm=norm, eps=eps,
                                   d_in_true=d_in, n_k=n_k)
        grid = (M_p // tm_eff, n_k)
        in_specs = [
            pl.BlockSpec((tm_eff, d_in_p), lambda i, k: (i, 0)),     # x rows (reused over k)
            pl.BlockSpec((d_in_p, tk_eff), lambda i, k: (0, k)),     # W1 hidden-slice
            pl.BlockSpec((1, tk_eff), lambda i, k: (0, k)),          # b1 hidden-slice
            pl.BlockSpec((tk_eff, d_in_p), lambda i, k: (k, 0)),     # W2 hidden-slice
            pl.BlockSpec((1, d_in_p), lambda i, k: (0, 0)),          # b2 (grid-invariant)
            pl.BlockSpec((1, d_in_p), lambda i, k: (0, 0)),          # gamma
            pl.BlockSpec((1, d_in_p), lambda i, k: (0, 0)),          # beta
        ]
        out_specs = pl.BlockSpec((tm_eff, d_in_p), lambda i, k: (i, 0))
        scratch_shapes = [pltpu.VMEM((tm_eff, d_in_p), jnp.float32)]
        dim_sem = ("parallel", "arbitrary")

    out = pl.pallas_call(
        kernel,
        out_shape=jax.ShapeDtypeStruct((M_p, d_in_p), x.dtype),
        grid_spec=pltpu.PrefetchScalarGridSpec(
            num_scalar_prefetch=0,
            grid=grid,
            in_specs=in_specs,
            out_specs=out_specs,
            scratch_shapes=scratch_shapes,
        ),
        compiler_params=pltpu.CompilerParams(
            dimension_semantics=dim_sem,
            vmem_limit_bytes=budget,
        ),
    )(x2d, w1_p, b1_p, w2_p, b2_p, gamma_p, beta_p)

    return out[:M, :d_in].reshape(B, S, d_in)


def _reference(x, w1, b1, w2, b2, gamma, beta, *, norm=False, eps=1e-6):
    h = jnp.maximum(x @ w1 + b1, 0.0)
    y = h @ w2 + b2 + x
    if norm:
        mean = jnp.mean(y, axis=-1, keepdims=True)
        var = jnp.mean((y - mean) ** 2, axis=-1, keepdims=True)
        y = (y - mean) * jax.lax.rsqrt(var + eps) * gamma + beta
    return y


if __name__ == "__main__":
    # Full-precision f32 matmuls everywhere so kernel and reference agree tightly.
    jax.config.update("jax_default_matmul_precision", "highest")

    ok = True

    def _run_case(B, S, d_in, d_hid, **kw):
        global ok
        key = jax.random.PRNGKey(0)
        kx, k1, k2, k3, k4 = jax.random.split(key, 5)
        x = jax.random.normal(kx, (B, S, d_in), dtype=jnp.float32)
        w1 = jax.random.normal(k1, (d_in, d_hid), dtype=jnp.float32) * 0.1
        b1 = jax.random.normal(k2, (d_hid,), dtype=jnp.float32) * 0.1
        w2 = jax.random.normal(k3, (d_hid, d_in), dtype=jnp.float32) * 0.1
        b2 = jax.random.normal(k4, (d_in,), dtype=jnp.float32) * 0.1
        gamma = jnp.ones((d_in,), jnp.float32)
        beta = jnp.zeros((d_in,), jnp.float32)
        for norm in (False, True):
            out = positionwise_feed_forward(x, w1, b1, w2, b2, gamma, beta, norm=norm, **kw)
            out = jax.block_until_ready(out)
            ref = _reference(x, w1, b1, w2, b2, gamma, beta, norm=norm)
            ok = ok and bool(jnp.allclose(out, ref, atol=1e-4, rtol=1e-4))

    # Weight-resident path, lane-aligned features.
    _run_case(2, 8, 128, 256)
    # Weight-resident path, unaligned features (exercises padding + masked LayerNorm).
    _run_case(2, 8, 32, 64)
    # Forced hidden-tiled fallback (reduction grid axis, fused acc init/finalize, n_k=4).
    _run_case(2, 8, 128, 512, weight_resident=False, tk=128)

    print("KERNEL_OK" if ok else "MISMATCH")
</pallas_src>

<mosaic_0001>
module attributes {stable_mosaic.version = 11 : i64} {
  func.func @_ffn_kernel_resident(%arg0: i32, %arg1: memref<8x128xf32, #tpu.memory_space<vmem>>, %arg2: memref<128x256xf32, #tpu.memory_space<vmem>>, %arg3: memref<1x256xf32, #tpu.memory_space<vmem>>, %arg4: memref<256x128xf32, #tpu.memory_space<vmem>>, %arg5: memref<1x128xf32, #tpu.memory_space<vmem>>, %arg6: memref<1x128xf32, #tpu.memory_space<vmem>>, %arg7: memref<1x128xf32, #tpu.memory_space<vmem>>, %arg8: memref<8x128xf32, #tpu.memory_space<vmem>>) attributes {dimension_semantics = [#tpu.dimension_semantics<parallel>], iteration_bounds = array<i64: 2>, scalar_prefetch = 0 : i64, scratch_operands = 0 : i64, tpu.core_type = #tpu.core_type<tc>, window_params = [{transform_indices = @transform_0, window_bounds = array<i64: 8, 128>}, {pipeline_mode = #tpu.pipeline_mode<synchronous>, transform_indices = @transform_1, window_bounds = array<i64: 128, 256>}, {pipeline_mode = #tpu.pipeline_mode<synchronous>, transform_indices = @transform_2, window_bounds = array<i64: 1, 256>}, {pipeline_mode = #tpu.pipeline_mode<synchronous>, transform_indices = @transform_3, window_bounds = array<i64: 256, 128>}, {pipeline_mode = #tpu.pipeline_mode<synchronous>, transform_indices = @transform_4, window_bounds = array<i64: 1, 128>}, {pipeline_mode = #tpu.pipeline_mode<synchronous>, transform_indices = @transform_5, window_bounds = array<i64: 1, 128>}, {pipeline_mode = #tpu.pipeline_mode<synchronous>, transform_indices = @transform_6, window_bounds = array<i64: 1, 128>}, {transform_indices = @transform_7, window_bounds = array<i64: 8, 128>}]} {
    %c0 = arith.constant 0 : index
    %c0_0 = arith.constant 0 : index
    %0 = vector.load %arg1[%c0, %c0_0] : memref<8x128xf32, #tpu.memory_space<vmem>>, vector<8x128xf32>
    %c0_1 = arith.constant 0 : index
    %c0_2 = arith.constant 0 : index
    %1 = vector.load %arg2[%c0_1, %c0_2] : memref<128x256xf32, #tpu.memory_space<vmem>>, vector<128x256xf32>
    %cst = arith.constant dense<0.000000e+00> : vector<8x256xf32>
    %2 = tpu.matmul %0, %1, %cst {dimension_numbers = #tpu.dot_dimension_numbers<[1], [0], [0], [1], [0, 0, 1, 1], [], []>, precision = #tpu.contract_precision<fp32>} : vector<8x128xf32>, vector<128x256xf32>, vector<8x256xf32> -> vector<8x256xf32>
    %c0_3 = arith.constant 0 : index
    %c0_4 = arith.constant 0 : index
    %3 = vector.load %arg3[%c0_3, %c0_4] : memref<1x256xf32, #tpu.memory_space<vmem>>, vector<1x256xf32>
    %4 = vector.broadcast %3 : vector<1x256xf32> to vector<8x256xf32>
    %5 = arith.addf %2, %4 : vector<8x256xf32>
    %cst_5 = arith.constant 0.000000e+00 : f32
    %6 = vector.broadcast %cst_5 : f32 to vector<8x256xf32>
    %7 = arith.maximumf %5, %6 : vector<8x256xf32>
    %c0_6 = arith.constant 0 : index
    %c0_7 = arith.constant 0 : index
    %8 = vector.load %arg4[%c0_6, %c0_7] : memref<256x128xf32, #tpu.memory_space<vmem>>, vector<256x128xf32>
    %cst_8 = arith.constant dense<0.000000e+00> : vector<8x128xf32>
    %9 = tpu.matmul %7, %8, %cst_8 {dimension_numbers = #tpu.dot_dimension_numbers<[1], [0], [0], [1], [0, 0, 1, 1], [], []>, precision = #tpu.contract_precision<fp32>} : vector<8x256xf32>, vector<256x128xf32>, vector<8x128xf32> -> vector<8x128xf32>
    %c0_9 = arith.constant 0 : index
    %c0_10 = arith.constant 0 : index
    %10 = vector.load %arg5[%c0_9, %c0_10] : memref<1x128xf32, #tpu.memory_space<vmem>>, vector<1x128xf32>
    %11 = vector.broadcast %10 : vector<1x128xf32> to vector<8x128xf32>
    %12 = arith.addf %9, %11 : vector<8x128xf32>
    %13 = arith.addf %12, %0 : vector<8x128xf32>
    %c0_11 = arith.constant 0 : index
    %c0_12 = arith.constant 0 : index
    %14 = vector.load %arg8[%c0_11, %c0_12] : memref<8x128xf32, #tpu.memory_space<vmem>>, vector<8x128xf32>
    tpu.vector_store %arg8[%c0_11, %c0_12], %13 {strides = array<i32>} : memref<8x128xf32, #tpu.memory_space<vmem>>, vector<8x128xf32>,
    return
  }
  func.func @transform_0(%arg0: i32) -> (i32, i32) {
    %c0_i32 = arith.constant 0 : i32
    %c0_i32_0 = arith.constant 0 : i32
    return %arg0, %c0_i32 : i32, i32
  }
  func.func @transform_1(%arg0: i32) -> (i32, i32) {
    %c0_i32 = arith.constant 0 : i32
    %c0_i32_0 = arith.constant 0 : i32
    %c0_i32_1 = arith.constant 0 : i32
    return %c0_i32, %c0_i32_0 : i32, i32
  }
  func.func @transform_2(%arg0: i32) -> (i32, i32) {
    %c0_i32 = arith.constant 0 : i32
    %c0_i32_0 = arith.constant 0 : i32
    %c0_i32_1 = arith.constant 0 : i32
    return %c0_i32, %c0_i32_0 : i32, i32
  }
  func.func @transform_3(%arg0: i32) -> (i32, i32) {
    %c0_i32 = arith.constant 0 : i32
    %c0_i32_0 = arith.constant 0 : i32
    %c0_i32_1 = arith.constant 0 : i32
    return %c0_i32, %c0_i32_0 : i32, i32
  }
  func.func @transform_4(%arg0: i32) -> (i32, i32) {
    %c0_i32 = arith.constant 0 : i32
    %c0_i32_0 = arith.constant 0 : i32
    %c0_i32_1 = arith.constant 0 : i32
    return %c0_i32, %c0_i32_0 : i32, i32
  }
  func.func @transform_5(%arg0: i32) -> (i32, i32) {
    %c0_i32 = arith.constant 0 : i32
    %c0_i32_0 = arith.constant 0 : i32
    %c0_i32_1 = arith.constant 0 : i32
    return %c0_i32, %c0_i32_0 : i32, i32
  }
  func.func @transform_6(%arg0: i32) -> (i32, i32) {
    %c0_i32 = arith.constant 0 : i32
    %c0_i32_0 = arith.constant 0 : i32
    %c0_i32_1 = arith.constant 0 : i32
    return %c0_i32, %c0_i32_0 : i32, i32
  }
  func.func @transform_7(%arg0: i32) -> (i32, i32) {
    %c0_i32 = arith.constant 0 : i32
    %c0_i32_0 = arith.constant 0 : i32
    return %arg0, %c0_i32 : i32, i32
  }
}

</mosaic_0001>

<bundles_post_ra>
// kernel: tpu_custom_call.1
= control target key start
LH: loop header
LB: loop body
LE: loop exit
PB: predicated region body
PF: predicated region fallthrough
CT: control target
= control target key end

     0   :  { %12 = vsyncpa [#allocation3], 0  ;;  %s4219_s0 = inlined_call_operand.hbm [shape: f32[16,128], index: 0, kind: input, shape index: {}]   ;;  %s4220_s1 = inlined_call_operand.hbm [shape: f32[128,256], index: 1, kind: input, shape index: {}]   ;;  %s4221_s2 = inlined_call_operand.vmem [shape: f32[1,256], index: 2, kind: input, shape index: {}]   ;;  %s4222_s3 = inlined_call_operand.hbm [shape: f32[256,128], index: 3, kind: input, shape index: {}]   ;;  %s4223_s4 = inlined_call_operand.vmem [shape: f32[1,128], index: 4, kind: input, shape index: {}]   ;;  %s4224_s5 = inlined_call_operand.vmem [shape: f32[1,128], index: 5, kind: input, shape index: {}]   ;;  %s4225_s6 = inlined_call_operand.vmem [shape: f32[1,128], index: 6, kind: input, shape index: {}]   ;;  %s4226_s7 = inlined_call_operand.hbm [shape: f32[16,128], index: 7, kind: output, shape index: {}]  }
   0x1   :  { %14 = vsyncpa [#allocation3 + $0x1], 0 }
   0x2   :  { %15 = vsyncpa [#allocation6], 0 }
   0x3   :  { %16 = vsyncpa [#allocation4], 0 }
   0x4   :  { %18 = vsyncpa [#allocation4 + $0x1], 0  ;;  %s3134_s24 = smov 0   ;;  %s3136_s25 = smov 0  }
   0x5   :  { %s3138_s26 = smov 0   ;;  %s3140_s27 = smov 0  }
   0x6 LB: > { %s3155_s5 = sadd.s32 4294967295, %s3083_s27   ;;  %s2231_s6 = sadd.s32 4294967294, %s3083_s27   ;;  %s3083_s27 = sphi %s3140_s27, %s4564_s27   ;;  %s3079_s26 = sphi %s3138_s26, %s4563_s26   ;;  %s3075_s25 = sphi %s3136_s25, %s4562_s25   ;;  %s3071_s24 = sphi %s3134_s24, %s4561_s24  }
   0x7   : > { %p44_p0 = scmp.ne.s32.totalorder %s3075_s25, %s3071_s24  ;;  %p4227_p1 = scmp.eq.s32.totalorder %s3155_s5, 0 }
   0x8   : > { %p200_p3 = scmp.eq.s32.totalorder %s2231_s6, 1  ;;  %p2232_p5 = scmp.ge.s32.totalorder %s3083_s27, 1 }
   0x9   : > { %p3164_p4 = por %p4227_p1, %p44_p0  ;;  %p207_p7 = scmp.lt.s32.totalorder %s3083_s27, 3 }
   0xa   : > { %p3169_p6 = por %p200_p3, %p44_p0  ;;  %s3085_s8 = smov [#allocation5]  }
   0xb   : > { %s4369_s28 = scalar_select %p3164_p4, 1, 0 }
   0xc   : > { %s4370_s29 = scalar_select %p3169_p6, 1, 0 }
   0xd   : > { %p3174_p8 = pnand %p2232_p5, %p207_p7  ;;  %s219_s9 = sshll.u32 %s3085_s8, 4  ;;  %s3178_s9 = int_to_ptr.vmem [resolvable:$true] %s219_s9 }
   0xe   : > { %s3086_s11 = smov [#allocation7]   ;;  %s2927_s15 = scalar_lea.hbm %s4220_s1, 4096 }
   0xf   : > { %p2866_p9 = pneg %p3174_p8  ;;  %s235_s12 = sshll.u32 %s3086_s11, 4  ;;  %s3189_s12 = int_to_ptr.vmem [resolvable:$true] %s235_s12 }
  0x10   : > { %p2928_p12 = scmp.ne.s32.totalorder %s4220_s1, %s2927_s15  ;;  %p2934_p5 = scmp.lt.u32.totalorder %s2927_s15, %s4220_s1 }
  0x11   : > { %p3185_p11 = pnand %p2866_p9, %p4227_p1 }
  0x13   : > { %p2929_p13 = pneg %p3185_p11 }
  0x15   : > { %p2930_p0 = pnand %p2929_p13, %p2928_p12 }
  0x17   : > { %p2931_p3 = pneg %p2930_p0 }
  0x19   : > { %p2936_p7 = pnand %p2934_p5, %p2931_p3 }
  0x1b   : > { %2939 = shalt.err (!%p2936_p7)
}
  0x1c   : > { %s2940_s20 = scalar_lea.vmem %s3178_s9, 4096  ;;  %p2948_p2 = scmp.lt.s32.totalorder %s3178_s9, %s3178_s9 }
  0x1d   : > { %p2941_p9 = scmp.ne.s32.totalorder %s3178_s9, %s2940_s20  ;;  %p2949_p12 = scmp.lt.s32.totalorder %s2940_s20, %s2940_s20 }
  0x1f   : > { %p2943_p10 = pnand %p2941_p9, %p2929_p13  ;;  %p2950_p0 = por %p2949_p12, %p2948_p2 }
  0x21   : > { %p2944_p1 = pneg %p2943_p10 }
  0x23   : > { %p2951_p6 = pnand %p2950_p0, %p2944_p1 }
  0x25   : > { %2954 = shalt.err (!%p2951_p6)
}
  0x26   : > { %s3087_s21 = smov 256   ;;  %s3088_s22 = smov 16  }
  0x27   : > { %2869 = dma.hbm_to_vmem [thread:$0]  (!%p3185_p11), %s4220_s1, 4096, %s3178_s9, [#allocation6], %s3087_s21, %s3087_s21, %s3088_s22  }
  0x28   : > { %s2955_s13 = scalar_lea.hbm %s4222_s3, 4096 }
  0x29   : > { %p2956_p2 = scmp.ne.s32.totalorder %s4222_s3, %s2955_s13  ;;  %p2962_p10 = scmp.lt.u32.totalorder %s2955_s13, %s4222_s3 }
  0x2b   : > { %p2958_p1 = pnand %p2956_p2, %p2929_p13 }
  0x2d   : > { %p2959_p6 = pneg %p2958_p1 }
  0x2f   : > { %p2964_p3 = pnand %p2962_p10, %p2959_p6 }
  0x31   : > { %2967 = shalt.err (!%p2964_p3)
}
  0x32   : > { %s2968_s9 = scalar_lea.vmem %s3189_s12, 4096  ;;  %p2976_p12 = scmp.lt.s32.totalorder %s3189_s12, %s3189_s12 }
  0x33   : > { %p2969_p5 = scmp.ne.s32.totalorder %s3189_s12, %s2968_s9  ;;  %p2977_p0 = scmp.lt.s32.totalorder %s2968_s9, %s2968_s9 }
  0x35   : > { %p2971_p7 = pnand %p2969_p5, %p2929_p13  ;;  %p2978_p2 = por %p2977_p0, %p2976_p12 }
  0x37   : > { %p2972_p9 = pneg %p2971_p7 }
  0x39   : > { %p2979_p1 = pnand %p2978_p2, %p2972_p9 }
  0x3b   : > { %2982 = shalt.err (!%p2979_p1)
}
  0x3c   : > { %s3089_s18 = smov 128   ;;  %s3090_s19 = smov 8  }
  0x3d   : > { %2872 = dma.hbm_to_vmem [thread:$0]  (!%p3185_p11), %s4222_s3, 4096, %s3189_s12, [#allocation6], %s3089_s18, %s3089_s18, %s3090_s19  }
  0x3e   : > { %s3244_s22 = sadd.s32 1, %s3083_s27   ;;  %s31_s6 = sadd.s32 1, %s3079_s26 }
  0x3f   : > { %s28_s23 = ssub.s32 %s3083_s27, %s3244_s22  ;;  %p38_p6 = scmp.ne.s32.totalorder %s3079_s26, %s3075_s25 }
  0x40   : > { %p29_p13 = scmp.eq.s32.totalorder %s28_s23, 0  ;;  %p39_p10 = scmp.eq.s32.totalorder %s3083_s27, 0 }
  0x41   : > { %p4373_p5 = scmp.eq.s32.totalorder %s3155_s5, 1  ;;  %p2883_p9 = scmp.lt.s32.totalorder %s3083_s27, 2 }
  0x42   : > { %s3253_s8 = scalar_select %p29_p13, %s3079_s26, %s31_s6  }
  0x43   : > { %p40_p3 = por %p39_p10, %p38_p6  ;;  %p3257_p7 = por %p4373_p5, %p38_p6 }
  0x44   : > { %s258_s10 = sand.u32 1, %s3079_s26   ;;  %s2237_s12 = sshll.u32 %s3083_s27, 7 }
  0x45   : > { %s4374_s11 = scalar_select %p3257_p7, 1, 0 }
  0x46   : > { %s2236_s13 = sshll.u32 %s258_s10, 3  ;;  %s3267_s16 = scalar_lea.hbm %s4219_s0, %s2237_s12 }
  0x47   : > { %s262_s17 = scalar_lea.vmem [#allocation2], %s2236_s13  ;;  %p3271_p11 = pnand %p2883_p9, %p40_p3 }
  0x48   : > { %s269_s9 = sshll.u32 %s262_s17, 4  ;;  %s259_s19 = scalar_lea.sflag [#allocation3], %s258_s10  ;;  %s3269_s9 = int_to_ptr.vmem [resolvable:$true] %s269_s9 }
  0x49   : > { %s2983_s20 = scalar_lea.hbm %s3267_s16, 128  ;;  %p2985_p0 = pneg %p3271_p11 }
  0x4a   : > { %p2984_p12 = scmp.ne.s32.totalorder %s3267_s16, %s2983_s20  ;;  %s2988_s6 = scalar_lea.hbm %s4219_s0, 256 }
  0x4b   : > { %p2989_p13 = scmp.lt.u32.totalorder %s3267_s16, %s4219_s0  ;;  %p2990_p6 = scmp.lt.u32.totalorder %s2988_s6, %s2983_s20 }
  0x4c   : > { %p2986_p2 = pnand %p2985_p0, %p2984_p12  ;;  %p2992_p3 = scmp.lt.u32.totalorder %s2983_s20, %s3267_s16 }
  0x4d   : > { %p2991_p10 = por %p2990_p6, %p2989_p13 }
  0x4e   : > { %p2987_p1 = pneg %p2986_p2 }
  0x4f   : > { %p2993_p5 = por %p2992_p3, %p2991_p10 }
  0x51   : > { %p2994_p9 = pnand %p2993_p5, %p2987_p1 }
  0x53   : > { %2997 = shalt.err (!%p2994_p9)
}
  0x54   : > { %s2998_s10 = scalar_lea.vmem %s3269_s9, 128  ;;  %s3091_s14 = smov [#allocation2]  }
  0x55   : > { %p2999_p12 = scmp.ne.s32.totalorder %s3269_s9, %s2998_s10  ;;  %s3003_s15 = sshll.u32 %s3091_s14, 4  ;;  %s3004_s15 = int_to_ptr.vmem [resolvable:$false] %s3003_s15 }
  0x56   : > { %s3005_s17 = scalar_lea.vmem %s3004_s15, 256  ;;  %p3006_p4 = scmp.lt.s32.totalorder %s3269_s9, %s3004_s15 }
  0x57   : > { %p3001_p2 = pnand %p2999_p12, %p2985_p0  ;;  %p3007_p13 = scmp.lt.s32.totalorder %s3005_s17, %s2998_s10 }
  0x59   : > { %p3002_p7 = pneg %p3001_p2  ;;  %p3008_p6 = por %p3007_p13, %p3006_p4 }
  0x5b   : > { %p3009_p10 = pnand %p3008_p6, %p3002_p7 }
  0x5d   : > { %3012 = shalt.err (!%p3009_p10)
}
  0x5e   : > { %2876 = dma.hbm_to_vmem [thread:$0]  (!%p3271_p11), %s3267_s16, 128, %s3269_s9, %s259_s19  }
  0x5f   : > { %278 = sbr.rel (%p3174_p8) target bundleno = 927 (0x39f), region = 48 }
  0x66   : > { %s3303_s20 = sand.u32 1, %s3075_s25   ;;  %p4376_p4 = scmp.ne.s32.totalorder %s4369_s28, 0 }
  0x67   : > { %s2239_s21 = sshll.u32 %s3303_s20, 3  ;;  %s281_s23 = scalar_lea.sflag [#allocation3], %s3303_s20 }
  0x68   : > { %s3309_s6 = scalar_lea.vmem [#allocation2], %s2239_s21 }
  0x69   : > { %3058 = dma.done.wait (%p4376_p4), %s281_s23, 128  }
  0x6a   : > { %3060 = vsyncadd (%p4376_p4), %s281_s23, 4294967168  ;;  %p4377_p7 = scmp.eq.s32.totalorder %s3155_s5, 0 }
  0x6c   : > { %3062 = dma.done.wait (%p4377_p7), [#allocation6], 8192   ;;  %p4378_p8 = pmov %p4377_p7 }
  0x6d   : > { %v4232_v0 = vmov 0.0   ;;  %v325_v1 = vld [vmem:[#allocation5 + $0x8] sm:$0xff]  ;;  %v327_v2 = vld [vmem:[#allocation5 + $0x18] sm:$0xff]  ;;  %v324_v3 = vld [vmem:[#allocation5] sm:$0xff]  ;;  %s2245_s18 = sshll.u32 %s3155_s5, 7  ;;  %s322_s19 = scalar_lea.vmem [#allocation8], %s2239_s21 }
  0x6e   : > { %3064 = vsyncadd (%p4378_p8), [#allocation6], 4294959104  ;;  %464 = vmatprep.mubr.f32.mxu0 %v4232_v0  ;;  %v368_v4 = vand.u32 4294901760, %v325_v1  ;;  %v372_v5 = vand.u32 4294901760, %v327_v2  ;;  %v326_v6 = vld [vmem:[#allocation5 + $0x10] sm:$0xff]  ;;  %v370_v7 = vand.u32 4294901760, %v324_v3  ;;  %s4175_s14 = scalar_lea.hbm %s4226_s7, %s2245_s18 }
  0x6f   : > { %v329_v8 = vld [vmem:[#allocation5 + $0x28] sm:$0xff]  ;;  %v331_v9 = vld [vmem:[#allocation5 + $0x38] sm:$0xff]  ;;  %v374_v10 = vand.u32 4294901760, %v326_v6  ;;  %v328_v13 = vld [vmem:[#allocation5 + $0x20] sm:$0xff]  ;;  %s2142_s13 = sshll.u32 %s322_s19, 4  ;;  %s2129_s15 = scalar_lea.sflag [#allocation4], %s3303_s20  ;;  %s4177_s13 = int_to_ptr.vmem [resolvable:$true] %s2142_s13 }
  0x70   : > { %v376_v11 = vand.u32 4294901760, %v329_v8  ;;  %v380_v12 = vand.u32 4294901760, %v331_v9  ;;  %v330_v14 = vld [vmem:[#allocation5 + $0x30] sm:$0xff]  ;;  %v333_v15 = vld [vmem:[#allocation5 + $0x48] sm:$0xff]  ;;  %v3320_v16 = vpack.c.bf16 %v372_v5, %v368_v4  ;;  %v335_v17 = vld [vmem:[#allocation5 + $0x58] sm:$0xff]  ;;  %v378_v23 = vand.u32 4294901760, %v328_v13 }
  0x71   : > { %v332_v18 = vld [vmem:[#allocation5 + $0x40] sm:$0xff]  ;;  %v334_v19 = vld [vmem:[#allocation5 + $0x50] sm:$0xff]  ;;  %v3322_v20 = vpack.c.bf16 %v374_v10, %v370_v7  ;;  %v337_v22 = vld [vmem:[#allocation5 + $0x68] sm:$0xff]  ;;  %v382_v24 = vand.u32 4294901760, %v330_v14  ;;  %v384_v25 = vand.u32 4294901760, %v333_v15  ;;  %v388_v26 = vand.u32 4294901760, %v335_v17 }
  0x72   : > { %4379 = vst [vmem:[#allocation12_spill] sm:$0xff] %v3320_v16  ;;  %v3324_v21 = vpack.c.bf16 %v380_v12, %v376_v11  ;;  %2459 = vmatprep.subr.bf16.mxu0 %v3320_v16  ;;  %v386_v27 = vand.u32 4294901760, %v332_v18  ;;  %v390_v28 = vand.u32 4294901760, %v334_v19  ;;  %v339_v29 = vld [vmem:[#allocation5 + $0x78] sm:$0xff]  ;;  %v336_v30 = vld [vmem:[#allocation5 + $0x60] sm:$0xff]  ;;  %v392_v32 = vand.u32 4294901760, %v337_v22 }
  0x73   : > { %4380 = vst [vmem:[#allocation13_spill] sm:$0xff] %v3322_v20  ;;  %2461 = vmatpush1.bf16.msra.mxu0 %v3322_v20  ;;  %v3329_v31 = vpack.c.bf16 %v382_v24, %v378_v23  ;;  %v338_v33 = vld [vmem:[#allocation5 + $0x70] sm:$0xff]  ;;  %v341_v34 = vld [vmem:[#allocation5 + $0x88] sm:$0xff]  ;;  %v343_v35 = vld [vmem:[#allocation5 + $0x98] sm:$0xff]  ;;  %v3331_v36 = vsub.f32 %v325_v1, %v368_v4  ;;  %v3333_v37 = vsub.f32 %v327_v2, %v372_v5  ;;  %v396_v43 = vand.u32 4294901760, %v339_v29  ;;  %s3013_s17 = scalar_lea.vmem %s4177_s13, 128 }
  0x74   : > { %4381 = vst [vmem:[#allocation14_spill] sm:$0xff] %v3324_v21  ;;  %2463 = vmatprep.subr.bf16.mxu0 %v3324_v21  ;;  %v3335_v38 = vsub.f32 %v324_v3, %v370_v7  ;;  %v3337_v39 = vpack.c.bf16 %v388_v26, %v384_v25  ;;  %v3339_v40 = vsub.f32 %v326_v6, %v374_v10  ;;  %v394_v44 = vand.u32 4294901760, %v336_v30  ;;  %v340_v48 = vld [vmem:[#allocation5 + $0x80] sm:$0xff]  ;;  %v342_v49 = vld [vmem:[#allocation5 + $0x90] sm:$0xff]  ;;  %v345_v54 = vld [vmem:[#allocation5 + $0xa8] sm:$0xff]  ;;  %p3014_p11 = scmp.ne.s32.totalorder %s4177_s13, %s3013_s17  ;;  %p4558_p0 = scmp.ne.s32.totalorder %s4374_s11, 0 }
  0x75   : > { %4382 = vst [vmem:[#allocation15_spill] sm:$0xff] %v3329_v31  ;;  %v3341_v41 = vsub.f32 %v329_v8, %v376_v11  ;;  %v3343_v42 = vpack.c.bf16 %v390_v28, %v386_v27  ;;  %v398_v45 = vand.u32 4294901760, %v338_v33  ;;  %v400_v46 = vand.u32 4294901760, %v341_v34  ;;  %v347_v55 = vld [vmem:[#allocation5 + $0xb8] sm:$0xff]  ;;  %v344_v56 = vld [vmem:[#allocation5 + $0xa0] sm:$0xff]  ;;  %v346_v61 = vld [vmem:[#allocation5 + $0xb0] sm:$0xff] }
  0x76   : > { %4383 = vst [vmem:[#allocation16_spill] sm:$0xff] %v3337_v39  ;;  %v404_v47 = vand.u32 4294901760, %v343_v35  ;;  %v3346_v50 = vsub.f32 %v331_v9, %v380_v12  ;;  %v3348_v51 = vsub.f32 %v328_v13, %v378_v23  ;;  %v3350_v52 = vsub.f32 %v330_v14, %v382_v24  ;;  %v349_v62 = vld [vmem:[#allocation5 + $0xc8] sm:$0xff]  ;;  %v351_v63 = vld [vmem:[#allocation5 + $0xd8] sm:$0xff]  ;;  %v348_v9 = vld [vmem:[#allocation5 + $0xc0] sm:$0xff]  ;;  %p3015_p1 = pnand %p3014_p11, %p4558_p0  ;;  %s3093_s5 = smov [#allocation8]  }
  0x77   : > { %4384 = vst [vmem:[#allocation17_spill] sm:$0xff] %v3343_v42  ;;  %2465 = vmatpush1.bf16.msra.mxu0 %v3329_v31  ;;  %v3353_v53 = vpack.c.bf16 %v396_v43, %v392_v32  ;;  %v3355_v57 = vsub.f32 %v333_v15, %v384_v25  ;;  %v3357_v58 = vsub.f32 %v335_v17, %v388_v26  ;;  %v402_v3 = vand.u32 4294901760, %v340_v48  ;;  %v350_v10 = vld [vmem:[#allocation5 + $0xd0] sm:$0xff]  ;;  %s3017_s21 = sshll.u32 %s3093_s5, 4  ;;  %s3018_s21 = int_to_ptr.vmem [resolvable:$false] %s3017_s21 }
  0x78   : > { %2467 = vmatprep.subr.bf16.mxu0 %v3337_v39  ;;  %v3359_v59 = vsub.f32 %v332_v18, %v386_v27  ;;  %v3361_v60 = vsub.f32 %v334_v19, %v390_v28  ;;  %v3363_v1 = vsub.f32 %v337_v22, %v392_v32  ;;  %v3365_v2 = vsub.f32 %v339_v29, %v396_v43  ;;  %v323_v26 = vld [vmem:[%s3309_s6] sm:$0xff]  ;;  %v353_v43 = vld [vmem:[#allocation5 + $0xe8] sm:$0xff]  ;;  %p3016_p3 = pneg %p3015_p1  ;;  %s3019_s23 = scalar_lea.vmem %s3018_s21, 256 }
  0x79   : > { %4385 = vst [vmem:[#allocation18_spill] sm:$0xff] %v3353_v53  ;;  %v406_v4 = vand.u32 4294901760, %v342_v49  ;;  %v3368_v5 = vpack.c.bf16 %v398_v45, %v394_v44  ;;  %v3370_v6 = vpack.c.bf16 %v404_v47, %v400_v46  ;;  %v408_v7 = vand.u32 4294901760, %v345_v54  ;;  %p3020_p5 = scmp.lt.s32.totalorder %s4177_s13, %s3018_s21  ;;  %p3021_p9 = scmp.lt.s32.totalorder %s3019_s23, %s3013_s17 }
  0x7a   : > { %v412_v8 = vand.u32 4294901760, %v347_v55  ;;  %v410_v11 = vand.u32 4294901760, %v344_v56  ;;  %v414_v12 = vand.u32 4294901760, %v346_v61  ;;  %v416_v13 = vand.u32 4294901760, %v349_v62 }
  0x7b   : > { %2469 = vmatpush1.bf16.msra.mxu0 %v3343_v42  ;;  %4386 = vst [vmem:[#allocation19_spill] sm:$0xff] %v3368_v5  ;;  %4387 = vst [vmem:[#allocation20_spill] sm:$0xff] %v3370_v6  ;;  %v420_v14 = vand.u32 4294901760, %v351_v63  ;;  %v3373_v15 = vsub.f32 %v336_v30, %v394_v44  ;;  %v3375_v17 = vsub.f32 %v338_v33, %v398_v45  ;;  %v418_v24 = vand.u32 4294901760, %v348_v9  ;;  %v355_v45 = vld [vmem:[#allocation5 + $0xf8] sm:$0xff]  ;;  %p3022_p12 = por %p3021_p9, %p3020_p5 }
  0x7c   : > { %2471 = vmatprep.subr.bf16.mxu0 %v3353_v53  ;;  %v3377_v18 = vsub.f32 %v341_v34, %v400_v46  ;;  %v3379_v19 = vsub.f32 %v343_v35, %v404_v47  ;;  %v3381_v22 = vpack.c.bf16 %v406_v4, %v402_v3  ;;  %v3383_v23 = vsub.f32 %v340_v48, %v402_v3 }
  0x7d   : > { %v422_v25 = vand.u32 4294901760, %v350_v10  ;;  %v3387_v27 = vsub.f32 %v342_v49, %v406_v4  ;;  %v3389_v28 = vpack.c.bf16 %v412_v8, %v408_v7  ;;  %v3391_v29 = vsub.f32 %v345_v54, %v408_v7  ;;  %p3023_p2 = pnand %p3022_p12, %p3016_p3 }
  0x7e   : > { %4388 = vst [vmem:[#allocation21_spill] sm:$0xff] %v3381_v22  ;;  %v3393_v30 = vsub.f32 %v347_v55, %v412_v8  ;;  %v3396_v32 = vpack.c.bf16 %v414_v12, %v410_v11  ;;  %v3398_v33 = vsub.f32 %v344_v56, %v410_v11  ;;  %v3400_v34 = vsub.f32 %v346_v61, %v414_v12  ;;  %v352_v56 = vld [vmem:[#allocation5 + $0xe0] sm:$0xff]  ;;  %v3416_v61 = vld [vmem:[#allocation5 + $0xf0] sm:$0xff] }
  0x7f   : > { %2473 = vmatpush1.bf16.msra.mxu0 %v3368_v5  ;;  %4389 = vst [vmem:[#allocation22_spill] sm:$0xff] %v3389_v28  ;;  %v3402_v35 = vpack.c.bf16 %v420_v14, %v416_v13  ;;  %v3404_v44 = vsub.f32 %v349_v62, %v416_v13  ;;  %v4230_v46 = vand.u32 4294901760, %v3331_v36  ;;  %v4231_v47 = vand.u32 4294901760, %v3333_v37 }
  0x80   : > { %2475 = vmatprep.subr.bf16.mxu0 %v3370_v6  ;;  %4390 = vst [vmem:[#allocation23_spill] sm:$0xff] %v3396_v32  ;;  %v3408_v48 = vand.u32 4294901760, %v323_v26  ;;  %v3410_v49 = vsub.f32 %v351_v63, %v420_v14  ;;  %v3412_v54 = vpack.c.bf16 %v422_v25, %v418_v24  ;;  %v3414_v55 = vsub.f32 %v348_v9, %v418_v24 }
  0x81   : > { %4391 = vst [vmem:[#allocation24_spill] sm:$0xff] %v3402_v35  ;;  %v4234_v3 = vand.u32 4294901760, %v3335_v38  ;;  %v3420_v62 = vsub.f32 %v350_v10, %v422_v25  ;;  %v424_v4 = vand.u32 4294901760, %v353_v43  ;;  %v479_v7 = vsub.f32 %v3331_v36, %v4230_v46 }
  0x82   : > { %4392 = vst [vmem:[#allocation25_spill] sm:$0xff] %v3410_v49  ;;  %4393 = vst [vmem:[#allocation26_spill] sm:$0xff] %v3412_v54  ;;  %v491_v63 = vsub.f32 %v3333_v37, %v4231_v47  ;;  %v428_v8 = vand.u32 4294901760, %v355_v45  ;;  %v3430_v9 = vsub.f32 %v323_v26, %v3408_v48  ;;  %v4235_v11 = vand.u32 4294901760, %v3339_v40 }
  0x83   : > { %4394 = vst [vmem:[#allocation27_spill] sm:$0xff] %v3414_v55  ;;  %2477 = vmatpush1.bf16.msra.mxu0 %v3381_v22  ;;  %4395 = vst [vmem:[#allocation28_spill] sm:$0xff] %v3420_v62  ;;  %v4240_v10 = vand.u32 4294901760, %v3341_v41  ;;  %v426_v12 = vand.u32 4294901760, %v352_v56  ;;  %v4241_v14 = vand.u32 4294901760, %v3346_v50  ;;  %v480_v25 = vand.u32 4294901760, %v479_v7 }
  0x84   : > { %2479 = vmatprep.subr.bf16.mxu0 %v3389_v28  ;;  %4396 = vst [vmem:[#allocation29_spill] sm:$0xff] %v3430_v9  ;;  %v492_v46 = vand.u32 4294901760, %v491_v63  ;;  %v485_v26 = vsub.f32 %v3335_v38, %v4234_v3  ;;  %v497_v0 = vsub.f32 %v3339_v40, %v4235_v11  ;;  %v4250_v63 = vand.u32 4294901760, %v3350_v52 }
  0x85   : > { %v503_v13 = vsub.f32 %v3341_v41, %v4240_v10  ;;  %v515_v7 = vsub.f32 %v3346_v50, %v4241_v14  ;;  %v3453_v47 = vpack.c.bf16 %v428_v8, %v424_v4  ;;  %v3455_v3 = vsub.f32 %v353_v43, %v424_v4 }
  0x86   : > { %v3457_v24 = vsub.f32 %v355_v45, %v428_v8  ;;  %v4400_v10 = vand.u32 4294901760, %v3348_v51  ;;  %v4255_v22 = vand.u32 4294901760, %v3357_v58  ;;  %v2490_v43 = vpack.c.bf16 %v492_v46, %v480_v25 }
  0x87   : > { %2481 = vmatpush1.bf16.msra.mxu0 %v3396_v32  ;;  %4397 = vst [vmem:[#allocation30_spill] sm:$0xff] %v3453_v47  ;;  %v4398_v32 = vand.u32 4294901760, %v3416_v61  ;;  %v4401_v45 = vand.u32 4294901760, %v3430_v9  ;;  %v486_v8 = vand.u32 4294901760, %v485_v26  ;;  %v504_v6 = vand.u32 4294901760, %v503_v13 }
  0x88   : > { %2483 = vmatprep.subr.bf16.mxu0 %v3402_v35  ;;  %v509_v14 = vsub.f32 %v3348_v51, %v4400_v10  ;;  %v521_v35 = vsub.f32 %v3350_v52, %v4250_v63  ;;  %v516_v5 = vand.u32 4294901760, %v515_v7  ;;  %v4258_v10 = vand.u32 4294901760, %v3361_v60 }
  0x89   : > { %v3462_v28 = vpack.c.bf16 %v4398_v32, %v426_v12  ;;  %v468_v4 = vsub.f32 %v3430_v9, %v4401_v45  ;;  %v498_v32 = vand.u32 4294901760, %v497_v0  ;;  %v4402_v63 = vand.u32 4294901760, %v3355_v57 }
  0x8a   : > { %v539_v25 = vsub.f32 %v3357_v58, %v4255_v22  ;;  %v4263_v26 = vand.u32 4294901760, %v3363_v1  ;;  %v4268_v45 = vand.u32 4294901760, %v3365_v2  ;;  %v510_v11 = vand.u32 4294901760, %v509_v14 }
  0x8b   : > { %4399 = vst [vmem:[#allocation31_spill] sm:$0xff] %v3462_v28  ;;  %2485 = vmatpush1.bf16.msra.mxu0 %v3412_v54  ;;  %v527_v46 = vsub.f32 %v3355_v57, %v4402_v63  ;;  %v522_v0 = vand.u32 4294901760, %v521_v35  ;;  %v4403_v13 = vand.u32 4294901760, %v3359_v59  ;;  %v469_v54 = vand.u32 4294901760, %v468_v4 }
  0x8c   : > { %2487 = vmatprep.subr.bf16.mxu0 %v3453_v47  ;;  %v545_v47 = vsub.f32 %v3361_v60, %v4258_v10  ;;  %v551_v63 = vsub.f32 %v3363_v1, %v4263_v26  ;;  %v563_v22 = vsub.f32 %v3365_v2, %v4268_v45  ;;  %v3500_v35 = vsub.f32 %v352_v56, %v426_v12 }
  0x8d   : > { %v533_v7 = vsub.f32 %v3359_v59, %v4403_v13  ;;  %v2492_v13 = vpack.c.bf16 %v498_v32, %v486_v8  ;;  %v4279_v53 = vand.u32 4294901760, %v3375_v17  ;;  %v4273_v10 = vand.u32 4294901760, %v3377_v18 }
  0x8e   : > { %v2494_v4 = vpack.c.bf16 %v516_v5, %v504_v6  ;;  %v528_v42 = vand.u32 4294901760, %v527_v46  ;;  %v540_v39 = vand.u32 4294901760, %v539_v25  ;;  %v4272_v26 = vand.u32 4294901760, %v3379_v19 }
  0x8f   : > { %2489 = vmatpush1.bf16.msra.mxu0 %v3462_v28  ;;  %v2496_v31 = vpack.c.bf16 %v522_v0, %v510_v11  ;;  %v534_v21 = vand.u32 4294901760, %v533_v7  ;;  %v546_v45 = vand.u32 4294901760, %v545_v47  ;;  %v4271_v14 = vand.u32 4294901760, %v3383_v23 }
  0x90   : > { %2491 = vmatprep.subr.bf16.mxu0 %v2490_v43  ;;  %v552_v28 = vand.u32 4294901760, %v551_v63  ;;  %v564_v56 = vand.u32 4294901760, %v563_v22  ;;  %v4404_v12 = vand.u32 4294901760, %v3373_v15  ;;  %v4274_v32 = vand.u32 4294901760, %v3387_v27 }
  0x91   : > { %v569_v5 = vsub.f32 %v3375_v17, %v4279_v53  ;;  %v575_v6 = vsub.f32 %v3377_v18, %v4273_v10  ;;  %v587_v47 = vsub.f32 %v3379_v19, %v4272_v26  ;;  %v4405_v22 = vmov 0.0  }
  0x92   : > { %470 = vmatmul.mubr.f32.vlgmr.msra.gmra.mrb[0].mxu0 %v469_v54  ;;  %v557_v8 = vsub.f32 %v3373_v15, %v4404_v12  ;;  %v2498_v54 = vpack.c.bf16 %v540_v39, %v528_v42  ;;  %v581_v11 = vsub.f32 %v3383_v23, %v4271_v14  ;;  %v4278_v43 = vand.u32 4294901760, %v3391_v29 }
  0x93   : > { %2493 = vmatpush1.bf16.msra.mxu0 %v2492_v13  ;;  %700 = vmatprep.mubr.f32.mxu0 %v4405_v22  ;;  %v4277_v46 = vand.u32 4294901760, %v3393_v30  ;;  %v4406_v25 = vand.u32 4294901760, %v3416_v61  ;;  %v593_v7 = vsub.f32 %v3387_v27, %v4274_v32  ;;  %v4275_v63 = vand.u32 4294901760, %v3398_v33 }
  0x94   : > { %2495 = vmatprep.subr.bf16.mxu0 %v2494_v4  ;;  %v4276_v39 = vand.u32 4294901760, %v3400_v34  ;;  %v2500_v42 = vpack.c.bf16 %v546_v45, %v534_v21  ;;  %v2502_v13 = vpack.c.bf16 %v564_v56, %v552_v28  ;;  %v558_v4 = vand.u32 4294901760, %v557_v8 }
  0x95   : > { %v3528_v0 = vsub.f32 %v3416_v61, %v4406_v25  ;;  %v4282_v12 = vand.u32 4294901760, %v3404_v44  ;;  %v570_v14 = vand.u32 4294901760, %v569_v5  ;;  %v576_v26 = vand.u32 4294901760, %v575_v6 }
  0x96   : > { %v588_v10 = vand.u32 4294901760, %v587_v47  ;;  %v634_v61 = vand.u32 4294901760, %v3410_v49  ;;  %v582_v25 = vand.u32 4294901760, %v581_v11  ;;  %v599_v32 = vsub.f32 %v3391_v29, %v4278_v43 }
  0x97   : > { %2497 = vmatpush1.bf16.msra.mxu0 %v2496_v31  ;;  %v611_v21 = vsub.f32 %v3393_v30, %v4277_v46  ;;  %v628_v28 = vand.u32 4294901760, %v3414_v55  ;;  %v594_v45 = vand.u32 4294901760, %v593_v7  ;;  %v605_v31 = vsub.f32 %v3398_v33, %v4275_v63 }
  0x98   : > { %2499 = vmatprep.subr.bf16.mxu0 %v2498_v54  ;;  %v617_v56 = vsub.f32 %v3400_v34, %v4276_v39  ;;  %v640_v8 = vand.u32 4294901760, %v3420_v62  ;;  %v623_v5 = vsub.f32 %v3404_v44, %v4282_v12  ;;  %v635_v6 = vsub.f32 %v3410_v49, %v634_v61 }
  0x99   : > { %v646_v47 = vand.u32 4294901760, %v3455_v3  ;;  %v658_v54 = vand.u32 4294901760, %v3457_v24  ;;  %v2504_v11 = vpack.c.bf16 %v570_v14, %v558_v4  ;;  %v629_v7 = vsub.f32 %v3414_v55, %v628_v28 }
  0x9a   : > { %v641_v63 = vsub.f32 %v3420_v62, %v640_v8  ;;  %v652_v39 = vand.u32 4294901760, %v3500_v35  ;;  %v2506_v46 = vpack.c.bf16 %v588_v10, %v576_v26  ;;  %v600_v43 = vand.u32 4294901760, %v599_v32 }
  0x9b   : > { %2501 = vmatpush1.bf16.msra.mxu0 %v2500_v42  ;;  %v612_v53 = vand.u32 4294901760, %v611_v21  ;;  %v2508_v20 = vpack.c.bf16 %v594_v45, %v582_v25  ;;  %v606_v12 = vand.u32 4294901760, %v605_v31  ;;  %v618_v9 = vand.u32 4294901760, %v617_v56 }
  0x9c   : > { %2503 = vmatprep.subr.bf16.mxu0 %v2502_v13  ;;  %v624_v16 = vand.u32 4294901760, %v623_v5  ;;  %v636_v49 = vand.u32 4294901760, %v635_v6  ;;  %v647_v22 = vsub.f32 %v3455_v3, %v646_v47  ;;  %v659_v42 = vsub.f32 %v3457_v24, %v658_v54 }
  0x9d   : > { %v630_v14 = vand.u32 4294901760, %v629_v7  ;;  %v642_v4 = vand.u32 4294901760, %v641_v63  ;;  %v653_v62 = vsub.f32 %v3500_v35, %v652_v39  ;;  %v664_v55 = vand.u32 4294901760, %v3528_v0 }
  0x9e   : > { %v2510_v10 = vpack.c.bf16 %v612_v53, %v600_v43  ;;  %v2512_v26 = vpack.c.bf16 %v618_v9, %v606_v12  ;;  %v2514_v32 = vpack.c.bf16 %v636_v49, %v624_v16  ;;  %v648_v13 = vand.u32 4294901760, %v647_v22 }
  0x9f   : > { %2505 = vmatpush1.bf16.msra.mxu0 %v2504_v11  ;;  %v660_v25 = vand.u32 4294901760, %v659_v42  ;;  %v2516_v21 = vpack.c.bf16 %v642_v4, %v630_v14  ;;  %v654_v45 = vand.u32 4294901760, %v653_v62  ;;  %v665_v31 = vsub.f32 %v3528_v0, %v664_v55 }
  0xa0   : > { %2507 = vmatprep.subr.bf16.mxu0 %v2506_v46  ;;  %v4407_v56 = vand.u32 4294901760, %v3331_v36  ;;  %v4408_v5 = vand.u32 4294901760, %v3333_v37  ;;  %v4409_v6 = vand.u32 4294901760, %v3335_v38  ;;  %v4410_v53 = vand.u32 4294901760, %v3339_v40 }
  0xa1   : > { %v4411_v16 = vand.u32 4294901760, %v3341_v41  ;;  %v4413_v62 = vand.u32 4294901760, %v3348_v51  ;;  %v4414_v22 = vand.u32 4294901760, %v3350_v52  ;;  %v4415_v46 = vand.u32 4294901760, %v3355_v57 }
  0xa2   : > { %v3569_v63 = vpack.c.bf16 %v4408_v5, %v4407_v56  ;;  %v3575_v9 = vpack.c.bf16 %v4410_v53, %v4409_v6  ;;  %v4416_v12 = vand.u32 4294901760, %v3357_v58  ;;  %v4417_v7 = vand.u32 4294901760, %v3359_v59 }
  0xa3   : > { %2509 = vmatpush1.bf16.msra.mxu0 %v2508_v20  ;;  %v4412_v20 = vand.u32 4294901760, %v3346_v50  ;;  %v3587_v43 = vpack.c.bf16 %v4414_v22, %v4413_v62  ;;  %v4418_v42 = vand.u32 4294901760, %v3361_v60  ;;  %v4419_v4 = vand.u32 4294901760, %v3363_v1 }
  0xa4   : > { %2511 = vmatprep.subr.bf16.mxu0 %v2510_v10  ;;  %v3593_v11 = vpack.c.bf16 %v4416_v12, %v4415_v46  ;;  %v4420_v10 = vand.u32 4294901760, %v3365_v2  ;;  %v4421_v5 = vand.u32 4294901760, %v3373_v15  ;;  %v4422_v6 = vand.u32 4294901760, %v3375_v17 }
  0xa5   : > { %v3581_v49 = vpack.c.bf16 %v4412_v20, %v4411_v16  ;;  %v3599_v14 = vpack.c.bf16 %v4418_v42, %v4417_v7  ;;  %v4423_v16 = vand.u32 4294901760, %v3377_v18  ;;  %v4424_v20 = vand.u32 4294901760, %v3379_v19 }
  0xa6   : > { %v3605_v56 = vpack.c.bf16 %v4420_v10, %v4419_v4  ;;  %v3611_v53 = vpack.c.bf16 %v4422_v6, %v4421_v5  ;;  %v4426_v22 = vand.u32 4294901760, %v3383_v23  ;;  %v4427_v46 = vand.u32 4294901760, %v3387_v27 }
  0xa7   : > { %v3617_v62 = vpack.c.bf16 %v4424_v20, %v4423_v16  ;;  %v4429_v7 = vand.u32 4294901760, %v3391_v29  ;;  %v4430_v42 = vand.u32 4294901760, %v3393_v30  ;;  %v4431_v10 = vand.u32 4294901760, %v3398_v33  ;;  %2513 = vmatpush1.bf16.msra.mxu0 %v2512_v26  ;;  %v1243_v26 = vld [vmem:[#allocation7 + $0x90] sm:$0xff] }
  0xa8   : > { %v3623_v12 = vpack.c.bf16 %v4427_v46, %v4426_v22  ;;  %v4432_v5 = vand.u32 4294901760, %v3400_v34  ;;  %v4433_v16 = vand.u32 4294901760, %v3404_v44  ;;  %v3641_v22 = vpack.c.bf16 %v640_v8, %v628_v28  ;;  %2515 = vmatprep.subr.bf16.mxu0 %v2514_v32  ;;  %v1241_v8 = vld [vmem:[#allocation7 + $0x80] sm:$0xff]  ;;  %v1244_v32 = vld [vmem:[#allocation7 + $0x98] sm:$0xff] }
  0xa9   : > { %4425 = vst [vmem:[#allocation32_spill] sm:$0xff] %v3617_v62  ;;  %v3629_v4 = vpack.c.bf16 %v4430_v42, %v4429_v7  ;;  %v666_v62 = vand.u32 4294901760, %v665_v31  ;;  %v3643_v46 = vpack.c.bf16 %v658_v54, %v646_v47  ;;  %v2518_v7 = vpack.c.bf16 %v660_v25, %v648_v13  ;;  %v1242_v47 = vld [vmem:[#allocation7 + $0x88] sm:$0xff]  ;;  %v1225_v54 = vld [vmem:[#allocation7] sm:$0xff]  ;;  %v1227_v13 = vld [vmem:[#allocation7 + $0x10] sm:$0xff] }
  0xaa   : > { %4428 = vst [vmem:[#allocation33_spill] sm:$0xff] %v3623_v12  ;;  %v3635_v6 = vpack.c.bf16 %v4432_v5, %v4431_v10  ;;  %v3639_v20 = vpack.c.bf16 %v634_v61, %v4433_v16  ;;  %v3645_v12 = vpack.c.bf16 %v664_v55, %v652_v39  ;;  %v2522_v10 = vpack.c.bf16 %v3333_v37, %v3331_v36  ;;  %v1228_v25 = vld [vmem:[#allocation7 + $0x18] sm:$0xff]  ;;  %v1229_v5 = vld [vmem:[#allocation7 + $0x20] sm:$0xff]  ;;  %v1230_v16 = vld [vmem:[#allocation7 + $0x28] sm:$0xff] }
  0xab   : > { %2517 = vmatpush1.bf16.msra.mxu0 %v2516_v21  ;;  %v2520_v42 = vpack.c.bf16 %v666_v62, %v654_v45  ;;  %v2524_v61 = vpack.c.bf16 %v3339_v40, %v3335_v38  ;;  %v2526_v28 = vpack.c.bf16 %v3346_v50, %v3341_v41  ;;  %v2528_v55 = vpack.c.bf16 %v3350_v52, %v3348_v51  ;;  %v1226_v41 = vld [vmem:[#allocation7 + $0x8] sm:$0xff]  ;;  %v1245_v21 = vld [vmem:[#allocation7 + $0xa0] sm:$0xff] }
  0xac   : > { %2519 = vmatprep.subr.bf16.mxu0 %v2518_v7  ;;  %v2530_v39 = vpack.c.bf16 %v3357_v58, %v3355_v57  ;;  %v2532_v36 = vpack.c.bf16 %v3361_v60, %v3359_v59  ;;  %v4434_v37 = vmov 0.0   ;;  %v1313_v38 = vand.u32 4294901760, %v1241_v8  ;;  %v1246_v62 = vld [vmem:[#allocation7 + $0xa8] sm:$0xff] }
  0xad   : > { %v1316_v40 = vand.u32 4294901760, %v1242_v47  ;;  %v1265_v50 = vand.u32 4294901760, %v1225_v54  ;;  %v2534_v51 = vpack.c.bf16 %v3365_v2, %v3363_v1  ;;  %v1268_v52 = vand.u32 4294901760, %v1226_v41 }
  0xae   : > { %v1319_v57 = vand.u32 4294901760, %v1243_v26  ;;  %v1322_v58 = vand.u32 4294901760, %v1244_v32  ;;  %v3665_v59 = vsub.f32 %v1241_v8, %v1313_v38  ;;  %v1274_v8 = vand.u32 4294901760, %v1228_v25 }
  0xaf   : > { %2521 = vmatpush1.bf16.msra.mxu0 %v2520_v42  ;;  %v3663_v45 = vpack.c.bf16 %v1316_v40, %v1313_v38  ;;  %v3667_v60 = vsub.f32 %v1242_v47, %v1316_v40  ;;  %v3669_v31 = vsub.f32 %v1225_v54, %v1265_v50  ;;  %v3671_v7 = vpack.c.bf16 %v1268_v52, %v1265_v50 }
  0xb0   : > { %2523 = vmatprep.subr.bf16.mxu0 %v2522_v10  ;;  %v3673_v1 = vsub.f32 %v1226_v41, %v1268_v52  ;;  %v3675_v2 = vpack.c.bf16 %v1322_v58, %v1319_v57  ;;  %v3677_v42 = vsub.f32 %v1243_v26, %v1319_v57  ;;  %v1247_v10 = vld [vmem:[#allocation7 + $0xb0] sm:$0xff]  ;;  %v1325_v47 = vand.u32 4294901760, %v1245_v21  ;;  %v1248_v41 = vld [vmem:[#allocation7 + $0xb8] sm:$0xff] }
  0xb1   : > { %4435 = vst [vmem:[#allocation34_spill] sm:$0xff] %v3663_v45  ;;  %4436 = vst [vmem:[#allocation35_spill] sm:$0xff] %v3671_v7  ;;  %2651 = vmatprep.subr.bf16.mxu1 %v3663_v45  ;;  %v1328_v54 = vand.u32 4294901760, %v1246_v62  ;;  %v1277_v38 = vand.u32 4294901760, %v1229_v5  ;;  %v1280_v40 = vand.u32 4294901760, %v1230_v16  ;;  %v1331_v50 = vand.u32 4294901760, %v1247_v10 }
  0xb2   : > { %702 = vmatmul.mubr.f32.vlgmr.msra.gmra.mrb[0].mxu0 %v3408_v48  ;;  %4437 = vst [vmem:[#allocation36_spill] sm:$0xff] %v3675_v2  ;;  %4438 = vst [vmem:[#allocation37_spill] sm:$0xff] %v3677_v42  ;;  %2653 = vmatpush3.bf16.msra.mxu1 %v3671_v7  ;;  %v1231_v52 = vld [vmem:[#allocation7 + $0x30] sm:$0xff]  ;;  %v3690_v57 = vsub.f32 %v1245_v21, %v1325_v47  ;;  %v1334_v42 = vand.u32 4294901760, %v1248_v41  ;;  %v2538_v21 = vpack.c.bf16 %v3379_v19, %v3377_v18 }
  0xb3   : > { %2525 = vmatpush1.bf16.msra.mxu0 %v2524_v61  ;;  %836 = vmatprep.mubr.f32.mxu0 %v4434_v37  ;;  %v3680_v61 = vsub.f32 %v1244_v32, %v1322_v58  ;;  %v3688_v32 = vsub.f32 %v1228_v25, %v1274_v8  ;;  %v1232_v58 = vld [vmem:[#allocation7 + $0x38] sm:$0xff]  ;;  %v3694_v7 = vpack.c.bf16 %v1328_v54, %v1325_v47  ;;  %v1283_v25 = vand.u32 4294901760, %v1231_v52  ;;  %v4451_v47 = vld [vmem:[#allocation14_spill] sm:$0xff] }
  0xb4   : > { %2527 = vmatprep.subr.bf16.mxu0 %v2526_v28  ;;  %v1271_v28 = vand.u32 4294901760, %v1227_v13  ;;  %2655 = vmatprep.subr.bf16.mxu1 %v3675_v2  ;;  %v3696_v45 = vsub.f32 %v1246_v62, %v1328_v54  ;;  %v3700_v2 = vsub.f32 %v1230_v16, %v1280_v40  ;;  %v3710_v62 = vpack.c.bf16 %v1334_v42, %v1331_v50  ;;  %v4452_v54 = vld [vmem:[#allocation15_spill] sm:$0xff] }
  0xb5   : > { %4439 = vst [vmem:[#allocation38_spill] sm:$0xff] %v3680_v61  ;;  %v3698_v61 = vsub.f32 %v1229_v5, %v1277_v38  ;;  %v3714_v5 = vsub.f32 %v1231_v52, %v1283_v25  ;;  %v2542_v18 = vpack.c.bf16 %v3393_v30, %v3391_v29  ;;  %v2550_v30 = vpack.c.bf16 %v3457_v24, %v3455_v3  ;;  %v4454_v3 = vld [vmem:[#allocation17_spill] sm:$0xff]  ;;  %v4455_v24 = vld [vmem:[#allocation18_spill] sm:$0xff]  ;;  %v4461_v52 = vld [vmem:[#allocation24_spill] sm:$0xff] }
  0xb6   : > { %v3684_v26 = vpack.c.bf16 %v1274_v8, %v1271_v28  ;;  %4440 = vst [vmem:[#allocation39_spill] sm:$0xff] %v3710_v62  ;;  %v2552_v8 = vpack.c.bf16 %v3528_v0, %v3500_v35  ;;  %v4456_v35 = vld [vmem:[#allocation19_spill] sm:$0xff]  ;;  %v4457_v0 = vld [vmem:[#allocation20_spill] sm:$0xff] }
  0xb7   : > { %2529 = vmatpush1.bf16.msra.mxu0 %v2528_v55  ;;  %v3686_v55 = vsub.f32 %v1227_v13, %v1271_v28  ;;  %v3702_v13 = vsub.f32 %v1247_v10, %v1331_v50  ;;  %4442 = vst [vmem:[#allocation41_spill] sm:$0xff] %v3714_v5  ;;  %v4445_v10 = vld [vmem:[#allocation25_spill] sm:$0xff]  ;;  %v4460_v50 = vld [vmem:[#allocation23_spill] sm:$0xff] }
  0xb8   : > { %2531 = vmatprep.subr.bf16.mxu0 %v2530_v39  ;;  %v2536_v39 = vpack.c.bf16 %v3375_v17, %v3373_v15  ;;  %2657 = vmatpush3.bf16.msra.mxu1 %v3684_v26  ;;  %v3707_v15 = vpack.c.bf16 %v1280_v40, %v1277_v38  ;;  %v1286_v17 = vand.u32 4294901760, %v1232_v58  ;;  %v2546_v28 = vpack.c.bf16 %v4445_v10, %v3404_v44  ;;  %v4450_v44 = vld [vmem:[#allocation13_spill] sm:$0xff]  ;;  %v4453_v38 = vld [vmem:[#allocation16_spill] sm:$0xff] }
  0xb9   : > { %2659 = vmatprep.subr.bf16.mxu1 %v3694_v7  ;;  %v4458_v40 = vld [vmem:[#allocation21_spill] sm:$0xff] }
  0xba   : > { %v3716_v16 = vsub.f32 %v1232_v58, %v1286_v17  ;;  %v3723_v19 = vpack.c.bf16 %v1286_v17, %v1283_v25  ;;  %v4462_v58 = vld [vmem:[#allocation26_spill] sm:$0xff]  ;;  %v4464_v25 = vld [vmem:[#allocation31_spill] sm:$0xff]  ;;  %v4467_v17 = vld [vmem:[#allocation33_spill] sm:$0xff] }
  0xbb   : > { %2533 = vmatpush1.bf16.msra.mxu0 %v2532_v36  ;;  %v3712_v36 = vsub.f32 %v1248_v41, %v1334_v42  ;;  %v2544_v42 = vpack.c.bf16 %v3400_v34, %v3398_v33  ;;  %v4448_v33 = vld [vmem:[#allocation12_spill] sm:$0xff]  ;;  %v4449_v34 = vld [vmem:[#allocation29_spill] sm:$0xff]  ;;  %v4459_v41 = vld [vmem:[#allocation22_spill] sm:$0xff] }
  0xbc   : > { %2535 = vmatprep.subr.bf16.mxu0 %v2534_v51  ;;  %4443 = vst [vmem:[#allocation42_spill] sm:$0xff] %v3716_v16  ;;  %v2540_v51 = vpack.c.bf16 %v3387_v27, %v3383_v23  ;;  %2661 = vmatpush3.bf16.msra.mxu1 %v3707_v15  ;;  %4444 = vst [vmem:[#allocation43_spill] sm:$0xff] %v3723_v19  ;;  %v4446_v23 = vld [vmem:[#allocation27_spill] sm:$0xff]  ;;  %v4447_v27 = vld [vmem:[#allocation28_spill] sm:$0xff] }
  0xbd   : > { %4441 = vst [vmem:[#allocation40_spill] sm:$0xff] %v3712_v36  ;;  %2663 = vmatprep.subr.bf16.mxu1 %v3710_v62  ;;  %v2548_v29 = vpack.c.bf16 %v4447_v27, %v4446_v23  ;;  %v1253_v23 = vld [vmem:[#allocation7 + $0xe0] sm:$0xff]  ;;  %v1254_v27 = vld [vmem:[#allocation7 + $0xe8] sm:$0xff] }
  0xbf   : > { %2537 = vmatpush1.bf16.msra.mxu0 %v2536_v39  ;;  %v4463_v39 = vld [vmem:[#allocation30_spill] sm:$0xff] }
  0xc0   : > { %2539 = vmatprep.subr.bf16.mxu0 %v2538_v21  ;;  %2665 = vmatpush3.bf16.msra.mxu1 %v3723_v19  ;;  %v4465_v21 = vand.u32 4294901760, %v4449_v34 }
  0xc3   : > { %2541 = vmatpush1.bf16.msra.mxu0 %v2540_v51  ;;  %v1235_v51 = vld [vmem:[#allocation7 + $0x50] sm:$0xff] }
  0xc4   : > { %2543 = vmatprep.subr.bf16.mxu0 %v2542_v18  ;;  %v1295_v18 = vand.u32 4294901760, %v1235_v51 }
  0xc7   : > { %2545 = vmatpush1.bf16.msra.mxu0 %v2544_v42 }
  0xc8   : > { %2547 = vmatprep.subr.bf16.mxu0 %v2546_v28 }
  0xcb   : > { %2549 = vmatpush1.bf16.msra.mxu0 %v2548_v29  ;;  %v1349_v29 = vand.u32 4294901760, %v1253_v23 }
  0xcc   : > { %2551 = vmatprep.subr.bf16.mxu0 %v2550_v30  ;;  %v1352_v30 = vand.u32 4294901760, %v1254_v27 }
  0xcf   : > { %2553 = vmatpush1.bf16.msra.mxu0 %v2552_v8  ;;  %v1237_v8 = vld [vmem:[#allocation7 + $0x60] sm:$0xff] }
  0xd0   : > { %2555 = vmatprep.subr.bf16.mxu0 %v4448_v33 }
  0xd2   : > { %839 = vmatmul.mubr.f32.vlgmr.msra.gmra.mrb[0].mxu0 %v4449_v34  ;;  %v1301_v34 = vand.u32 4294901760, %v1237_v8 }
  0xd3   : > { %2557 = vmatpush1.bf16.msra.mxu0 %v4450_v44  ;;  %941 = vmatprep.mubr.f32.mxu0 %v4434_v37 }
  0xd4   : > { %2559 = vmatprep.subr.bf16.mxu0 %v4451_v47 }
  0xd7   : > { %2561 = vmatpush1.bf16.msra.mxu0 %v4452_v54 }
  0xd8   : > { %2563 = vmatprep.subr.bf16.mxu0 %v4453_v38 }
  0xdb   : > { %2565 = vmatpush1.bf16.msra.mxu0 %v4454_v3 }
  0xdc   : > { %2567 = vmatprep.subr.bf16.mxu0 %v4455_v24 }
  0xdf   : > { %2569 = vmatpush1.bf16.msra.mxu0 %v4456_v35 }
  0xe0   : > { %2571 = vmatprep.subr.bf16.mxu0 %v4457_v0 }
  0xe3   : > { %2573 = vmatpush1.bf16.msra.mxu0 %v4458_v40 }
  0xe4   : > { %2575 = vmatprep.subr.bf16.mxu0 %v4459_v41 }
  0xe7   : > { %2577 = vmatpush1.bf16.msra.mxu0 %v4460_v50 }
  0xe8   : > { %2579 = vmatprep.subr.bf16.mxu0 %v4461_v52 }
  0xeb   : > { %2581 = vmatpush1.bf16.msra.mxu0 %v4462_v58 }
  0xec   : > { %2583 = vmatprep.subr.bf16.mxu0 %v4463_v39 }
  0xef   : > { %2585 = vmatpush1.bf16.msra.mxu0 %v4464_v25 }
  0xf0   : > { %2587 = vmatprep.subr.bf16.mxu0 %v3569_v63  ;;  %v4466_v63 = vld [vmem:[#allocation32_spill] sm:$0xff] }
  0xf2   : > { %945 = vmatmul.mubr.f32.vlgmr.msra.gmra.mrb[0].mxu0 %v4465_v21  ;;  %v3826_v21 = vsub.f32 %v1253_v23, %v1349_v29 }
  0xf3   : > { %2589 = vmatpush1.bf16.msra.mxu0 %v3575_v9  ;;  %1111 = vmatprep.mubr.f32.mxu0 %v4434_v37  ;;  %v1249_v9 = vld [vmem:[#allocation7 + $0xc0] sm:$0xff] }
  0xf4   : > { %2591 = vmatprep.subr.bf16.mxu0 %v3581_v49  ;;  %v1250_v49 = vld [vmem:[#allocation7 + $0xc8] sm:$0xff]  ;;  %4482 = vst [vmem:[#allocation22_spill] sm:$0xff] %v3826_v21 }
  0xf7   : > { %2593 = vmatpush1.bf16.msra.mxu0 %v3587_v43  ;;  %v1337_v43 = vand.u32 4294901760, %v1249_v9 }
  0xf8   : > { %2595 = vmatprep.subr.bf16.mxu0 %v3593_v11  ;;  %v1340_v11 = vand.u32 4294901760, %v1250_v49 }
  0xfb   : > { %2597 = vmatpush1.bf16.msra.mxu0 %v3599_v14  ;;  %v1233_v14 = vld [vmem:[#allocation7 + $0x40] sm:$0xff] }
  0xfc   : > { %2599 = vmatprep.subr.bf16.mxu0 %v3605_v56  ;;  %v1234_v56 = vld [vmem:[#allocation7 + $0x48] sm:$0xff] }
  0xff   : > { %2601 = vmatpush1.bf16.msra.mxu0 %v3611_v53  ;;  %v1289_v53 = vand.u32 4294901760, %v1233_v14 }
 0x100   : > { %2603 = vmatprep.subr.bf16.mxu0 %v4466_v63  ;;  %v3828_v63 = vsub.f32 %v1254_v27, %v1352_v30  ;;  %v4298_v27 = vand.u32 4294901760, %v3673_v1 }
 0x102   : > { %4483 = vst [vmem:[#allocation23_spill] sm:$0xff] %v3828_v63 }
 0x103   : > { %2605 = vmatpush1.bf16.msra.mxu0 %v4467_v17  ;;  %v3831_v17 = vsub.f32 %v1237_v8, %v1301_v34 }
 0x104   : > { %2607 = vmatprep.subr.bf16.mxu0 %v3629_v4  ;;  %v3793_v4 = vpack.c.bf16 %v1340_v11, %v1337_v43 }
 0x105   : > { %4484 = vst [vmem:[#allocation24_spill] sm:$0xff] %v3831_v17 }
 0x106   : > { %4468 = vst [vmem:[#allocation25_spill] sm:$0xff] %v3793_v4  ;;  %2667 = vmatprep.subr.bf16.mxu1 %v3793_v4 }
 0x107   : > { %2609 = vmatpush1.bf16.msra.mxu0 %v3635_v6 }
 0x108   : > { %2611 = vmatprep.subr.bf16.mxu0 %v3639_v20  ;;  %v1251_v20 = vld [vmem:[#allocation7 + $0xd0] sm:$0xff] }
 0x10b   : > { %2613 = vmatpush1.bf16.msra.mxu0 %v3641_v22  ;;  %v1252_v22 = vld [vmem:[#allocation7 + $0xd8] sm:$0xff] }
 0x10c   : > { %2615 = vmatprep.subr.bf16.mxu0 %v3643_v46  ;;  %v1343_v46 = vand.u32 4294901760, %v1251_v20 }
 0x10f   : > { %2617 = vmatpush1.bf16.msra.mxu0 %v3645_v12  ;;  %v1292_v12 = vand.u32 4294901760, %v1234_v56 }
 0x110   : > { %2619 = vmatprep.subr.bf16.mxu0 %v4448_v33  ;;  %v1238_v33 = vld [vmem:[#allocation7 + $0x68] sm:$0xff] }
 0x111   : > { %v3795_v6 = vpack.c.bf16 %v1292_v12, %v1289_v53 }
 0x112   : > { %1113 = vmatmul.mubr.f32.vlgmr.msra.gmra.mrb[0].mxu0 %v3408_v48 }
 0x113   : > { %2621 = vmatpush1.bf16.msra.mxu0 %v4450_v44  ;;  %1215 = vmatprep.mubr.f32.mxu0 %v4434_v37  ;;  %4469 = vst [vmem:[#allocation27_spill] sm:$0xff] %v3795_v6  ;;  %v1346_v37 = vand.u32 4294901760, %v1252_v22  ;;  %v1304_v44 = vand.u32 4294901760, %v1238_v33 }
 0x114   : > { %2623 = vmatprep.subr.bf16.mxu0 %v4451_v47  ;;  %2669 = vmatpush3.bf16.msra.mxu1 %v3795_v6  ;;  %v3805_v47 = vpack.c.bf16 %v1352_v30, %v1349_v29  ;;  %v4492_v29 = vld [vmem:[#allocation37_spill] sm:$0xff] }
 0x115   : > { %v3799_v10 = vpack.c.bf16 %v1346_v37, %v1343_v46  ;;  %v4300_v30 = vand.u32 4294901760, %v4492_v29 }
 0x116   : > { %4472 = vst [vmem:[#allocation29_spill] sm:$0xff] %v3805_v47 }
 0x117   : > { %2625 = vmatpush1.bf16.msra.mxu0 %v4452_v54  ;;  %4470 = vst [vmem:[#allocation28_spill] sm:$0xff] %v3799_v10  ;;  %2671 = vmatprep.subr.bf16.mxu1 %v3799_v10  ;;  %v3807_v54 = vsub.f32 %v1249_v9, %v1337_v43  ;;  %v3833_v9 = vsub.f32 %v1238_v33, %v1304_v44  ;;  %v4493_v33 = vld [vmem:[#allocation38_spill] sm:$0xff] }
 0x118   : > { %2627 = vmatprep.subr.bf16.mxu0 %v4453_v38  ;;  %v3809_v38 = vsub.f32 %v1250_v49, %v1340_v11 }
 0x119   : > { %4473 = vst [vmem:[#allocation13_spill] sm:$0xff] %v3807_v54  ;;  %4485 = vst [vmem:[#allocation26_spill] sm:$0xff] %v3833_v9 }
 0x11a   : > { %4474 = vst [vmem:[#allocation14_spill] sm:$0xff] %v3809_v38 }
 0x11b   : > { %2629 = vmatpush1.bf16.msra.mxu0 %v4454_v3  ;;  %v3811_v3 = vpack.c.bf16 %v1304_v44, %v1301_v34  ;;  %v4303_v34 = vand.u32 4294901760, %v4493_v33  ;;  %v4304_v44 = vand.u32 4294901760, %v3686_v55 }
 0x11c   : > { %2631 = vmatprep.subr.bf16.mxu0 %v4455_v24  ;;  %v1255_v24 = vld [vmem:[#allocation7 + $0xf0] sm:$0xff] }
 0x11d   : > { %4475 = vst [vmem:[#allocation15_spill] sm:$0xff] %v3811_v3  ;;  %v1355_v49 = vand.u32 4294901760, %v1255_v24 }
 0x11f   : > { %2633 = vmatpush1.bf16.msra.mxu0 %v4456_v35  ;;  %v1256_v35 = vld [vmem:[#allocation7 + $0xf8] sm:$0xff] }
 0x120   : > { %2635 = vmatprep.subr.bf16.mxu0 %v4457_v0  ;;  %v3813_v0 = vsub.f32 %v1233_v14, %v1289_v53  ;;  %v1358_v43 = vand.u32 4294901760, %v1256_v35  ;;  %v4301_v53 = vand.u32 4294901760, %v3667_v60 }
 0x122   : > { %4476 = vst [vmem:[#allocation16_spill] sm:$0xff] %v3813_v0 }
 0x123   : > { %2637 = vmatpush1.bf16.msra.mxu0 %v4458_v40  ;;  %v3815_v40 = vsub.f32 %v1234_v56, %v1292_v12  ;;  %v4302_v56 = vand.u32 4294901760, %v3665_v59  ;;  %v3837_v12 = vpack.c.bf16 %v1358_v43, %v1355_v49 }
 0x124   : > { %2639 = vmatprep.subr.bf16.mxu0 %v4459_v41  ;;  %v3817_v41 = vsub.f32 %v1251_v20, %v1343_v46  ;;  %v3839_v20 = vsub.f32 %v1255_v24, %v1355_v49  ;;  %v4299_v46 = vand.u32 4294901760, %v3669_v31  ;;  %v4305_v24 = vand.u32 4294901760, %v3688_v32 }
 0x125   : > { %4477 = vst [vmem:[#allocation17_spill] sm:$0xff] %v3815_v40  ;;  %4486 = vst [vmem:[#allocation30_spill] sm:$0xff] %v3837_v12  ;;  %v1506_v49 = vsub.f32 %v4492_v29, %v4300_v30 }
 0x126   : > { %4478 = vst [vmem:[#allocation18_spill] sm:$0xff] %v3817_v41  ;;  %4487 = vst [vmem:[#allocation31_spill] sm:$0xff] %v3839_v20  ;;  %v1380_v23 = vsub.f32 %v3669_v31, %v4299_v46  ;;  %v4307_v46 = vand.u32 4294901760, %v3696_v45 }
 0x127   : > { %2641 = vmatpush1.bf16.msra.mxu0 %v4460_v50  ;;  %v3819_v50 = vsub.f32 %v1252_v22, %v1346_v37  ;;  %v3841_v22 = vsub.f32 %v1256_v35, %v1358_v43  ;;  %v1513_v43 = vsub.f32 %v4493_v33, %v4303_v34 }
 0x128   : > { %2643 = vmatprep.subr.bf16.mxu0 %v4461_v52  ;;  %v1239_v52 = vld [vmem:[#allocation7 + $0x70] sm:$0xff] }
 0x129   : > { %4479 = vst [vmem:[#allocation19_spill] sm:$0xff] %v3819_v50  ;;  %v1307_v11 = vand.u32 4294901760, %v1239_v52  ;;  %4488 = vst [vmem:[#allocation32_spill] sm:$0xff] %v3841_v22  ;;  %v1514_v30 = vand.u32 4294901760, %v1513_v43 }
 0x12b   : > { %2645 = vmatpush1.bf16.msra.mxu0 %v4462_v58  ;;  %v1240_v58 = vld [vmem:[#allocation7 + $0x78] sm:$0xff] }
 0x12c   : > { %2647 = vmatprep.subr.bf16.mxu0 %v4463_v39  ;;  %v3822_v39 = vsub.f32 %v1235_v51, %v1295_v18  ;;  %v1310_v14 = vand.u32 4294901760, %v1240_v58  ;;  %v3846_v51 = vsub.f32 %v1239_v52, %v1307_v11  ;;  %v1381_v52 = vand.u32 4294901760, %v1380_v23 }
 0x12e   : > { %4480 = vst [vmem:[#allocation20_spill] sm:$0xff] %v3822_v39  ;;  %v3844_v37 = vpack.c.bf16 %v1310_v14, %v1307_v11  ;;  %4490 = vst [vmem:[#allocation44_spill] sm:$0xff] %v3846_v51  ;;  %v1394_v11 = vsub.f32 %v3686_v55, %v4304_v44  ;;  %v4348_v6 = vand.u32 4294901760, %v3846_v51 }
 0x12f   : > { %2649 = vmatpush1.bf16.msra.mxu0 %v4464_v25 }
 0x130   : > { %4489 = vst [vmem:[#allocation33_spill] sm:$0xff] %v3844_v37 }
 0x132   : > { %1217 = vmatmul.mubr.f32.vlgmr.msra.gmra.mrb[0].mxu0 %v3408_v48  ;;  %v1236_v48 = vld [vmem:[#allocation7 + $0x58] sm:$0xff] }
 0x133   : > { %v1298_v42 = vand.u32 4294901760, %v1236_v48 }
 0x135   : > { %v3801_v28 = vpack.c.bf16 %v1298_v42, %v1295_v18  ;;  %v3824_v25 = vsub.f32 %v1236_v48, %v1298_v42  ;;  %v3848_v48 = vsub.f32 %v1240_v58, %v1310_v14  ;;  %v1492_v18 = vsub.f32 %v3665_v59, %v4302_v56 }
 0x136   : > { %v1499_v42 = vsub.f32 %v3667_v60, %v4301_v53  ;;  %v1387_v58 = vsub.f32 %v3673_v1, %v4298_v27  ;;  %v1401_v14 = vsub.f32 %v3688_v32, %v4305_v24  ;;  %v1507_v27 = vand.u32 4294901760, %v1506_v49 }
 0x137   : > { %4471 = vst [vmem:[#allocation12_spill] sm:$0xff] %v3801_v28  ;;  %2673 = vmatpush3.bf16.msra.mxu1 %v3801_v28  ;;  %4481 = vst [vmem:[#allocation21_spill] sm:$0xff] %v3824_v25  ;;  %v1493_v8 = vand.u32 4294901760, %v1492_v18  ;;  %v4310_v18 = vand.u32 4294901760, %v3690_v57  ;;  %v1395_v53 = vand.u32 4294901760, %v1394_v11  ;;  %v1527_v24 = vsub.f32 %v3696_v45, %v4307_v46 }
 0x138   : > { %2675 = vmatprep.subr.bf16.mxu1 %v3805_v47  ;;  %4491 = vst [vmem:[#allocation45_spill] sm:$0xff] %v3848_v48  ;;  %v1500_v35 = vand.u32 4294901760, %v1499_v42  ;;  %v1388_v23 = vand.u32 4294901760, %v1387_v58  ;;  %v1402_v56 = vand.u32 4294901760, %v1401_v14  ;;  %v3893_v58 = vpack.c.bf16 %v1514_v30, %v1507_v27 }
 0x139   : > { %v1520_v34 = vsub.f32 %v3690_v57, %v4310_v18  ;;  %v4309_v11 = vand.u32 4294901760, %v3702_v13  ;;  %v1528_v14 = vand.u32 4294901760, %v1527_v24  ;;  %v4317_v18 = vand.u32 4294901760, %v3807_v54 }
 0x13a   : > { %v2682_v42 = vpack.c.bf16 %v1500_v35, %v1493_v8  ;;  %v3886_v44 = vpack.c.bf16 %v1388_v23, %v1381_v52  ;;  %v4306_v8 = vand.u32 4294901760, %v3698_v61  ;;  %v4308_v35 = vand.u32 4294901760, %v3700_v2 }
 0x13b   : > { %2677 = vmatpush3.bf16.msra.mxu1 %v3811_v3  ;;  %v3895_v49 = vpack.c.bf16 %v1402_v56, %v1395_v53  ;;  %v1521_v43 = vand.u32 4294901760, %v1520_v34  ;;  %v4313_v23 = vand.u32 4294901760, %v3712_v36  ;;  %v1534_v27 = vsub.f32 %v3702_v13, %v4309_v11 }
 0x13c   : > { %2679 = vmatprep.subr.bf16.mxu1 %v3837_v12  ;;  %v1408_v52 = vsub.f32 %v3698_v61, %v4306_v8  ;;  %v4314_v56 = vand.u32 4294901760, %v3714_v5  ;;  %v4318_v53 = vand.u32 4294901760, %v3716_v16  ;;  %v4330_v3 = vand.u32 4294901760, %v3822_v39 }
 0x13d   : > { %v3910_v30 = vpack.c.bf16 %v1528_v14, %v1521_v43  ;;  %v1541_v8 = vsub.f32 %v3712_v36, %v4313_v23  ;;  %v1535_v46 = vand.u32 4294901760, %v1534_v27  ;;  %v4321_v14 = vand.u32 4294901760, %v3809_v38 }
 0x13e   : > { %v1409_v34 = vand.u32 4294901760, %v1408_v52  ;;  %v1429_v11 = vsub.f32 %v3716_v16, %v4318_v53  ;;  %v4322_v52 = vand.u32 4294901760, %v3813_v0  ;;  %v1548_v27 = vsub.f32 %v3807_v54, %v4317_v18 }
 0x13f   : > { %2681 = vmatpush3.bf16.msra.mxu1 %v3844_v37  ;;  %v1542_v43 = vand.u32 4294901760, %v1541_v8  ;;  %v4324_v18 = vand.u32 4294901760, %v3817_v41  ;;  %v4338_v28 = vand.u32 4294901760, %v3831_v17 }
 0x140   : > { %2683 = vmatprep.subr.bf16.mxu1 %v2682_v42  ;;  %v1415_v42 = vsub.f32 %v3700_v2, %v4308_v35  ;;  %v1422_v35 = vsub.f32 %v3714_v5, %v4314_v56  ;;  %v1430_v23 = vand.u32 4294901760, %v1429_v11  ;;  %v4323_v56 = vand.u32 4294901760, %v3815_v40 }
 0x141   : > { %v3930_v12 = vpack.c.bf16 %v1542_v43, %v1535_v46  ;;  %v1436_v8 = vsub.f32 %v3813_v0, %v4322_v52  ;;  %v4329_v43 = vand.u32 4294901760, %v3819_v50  ;;  %v1562_v52 = vsub.f32 %v3817_v41, %v4324_v18 }
 0x142   : > { %v1416_v24 = vand.u32 4294901760, %v1415_v42  ;;  %v1423_v42 = vand.u32 4294901760, %v1422_v35  ;;  %v1549_v35 = vand.u32 4294901760, %v1548_v27  ;;  %v1443_v11 = vsub.f32 %v3815_v40, %v4323_v56 }
 0x143   : > { %v1437_v46 = vand.u32 4294901760, %v1436_v8  ;;  %v1569_v27 = vsub.f32 %v3819_v50, %v4329_v43  ;;  %v1563_v56 = vand.u32 4294901760, %v1562_v52  ;;  %v4332_v18 = vand.u32 4294901760, %v3826_v21 }
 0x144   : > { %v3922_v37 = vpack.c.bf16 %v1416_v24, %v1409_v34  ;;  %v1555_v34 = vsub.f32 %v3809_v38, %v4321_v14  ;;  %v3938_v24 = vpack.c.bf16 %v1430_v23, %v1423_v42  ;;  %v1444_v14 = vand.u32 4294901760, %v1443_v11 }
 0x145   : > { %v4331_v23 = vand.u32 4294901760, %v3824_v25  ;;  %v1570_v47 = vand.u32 4294901760, %v1569_v27  ;;  %v1464_v27 = vsub.f32 %v3831_v17, %v4338_v28 }
 0x146   : > { %v1556_v53 = vand.u32 4294901760, %v1555_v34  ;;  %v1450_v34 = vsub.f32 %v3822_v39, %v4330_v3  ;;  %v3958_v8 = vpack.c.bf16 %v1444_v14, %v1437_v46  ;;  %v1576_v3 = vsub.f32 %v3826_v21, %v4332_v18 }
 0x147   : > { %v1457_v11 = vsub.f32 %v3824_v25, %v4331_v23  ;;  %v4339_v14 = vand.u32 4294901760, %v3833_v9  ;;  %v3970_v52 = vpack.c.bf16 %v1570_v47, %v1563_v56  ;;  %v4342_v18 = vand.u32 4294901760, %v3839_v20 }
 0x148   : > { %v3950_v42 = vpack.c.bf16 %v1556_v53, %v1549_v35  ;;  %v1451_v53 = vand.u32 4294901760, %v1450_v34  ;;  %v4337_v35 = vand.u32 4294901760, %v3828_v63  ;;  %v1577_v23 = vand.u32 4294901760, %v1576_v3 }
 0x149   : > { %v1458_v43 = vand.u32 4294901760, %v1457_v11  ;;  %v1471_v11 = vsub.f32 %v3833_v9, %v4339_v14  ;;  %v1465_v47 = vand.u32 4294901760, %v1464_v27  ;;  %v4347_v56 = vand.u32 4294901760, %v3841_v22 }
 0x14a   : > { %v1583_v46 = vsub.f32 %v3828_v63, %v4337_v35  ;;  %v1590_v28 = vsub.f32 %v3839_v20, %v4342_v18 }
 0x14b   : > { %v3978_v34 = vpack.c.bf16 %v1458_v43, %v1451_v53  ;;  %v1472_v35 = vand.u32 4294901760, %v1471_v11  ;;  %v4349_v43 = vand.u32 4294901760, %v3848_v48  ;;  %v1597_v53 = vsub.f32 %v3841_v22, %v4347_v56 }
 0x14c   : > { %v1584_v10 = vand.u32 4294901760, %v1583_v46  ;;  %v1478_v46 = vsub.f32 %v3846_v51, %v4348_v6  ;;  %v1591_v14 = vand.u32 4294901760, %v1590_v28  ;;  %v2716_v56 = vpack.c.bf16 %v3673_v1, %v3669_v31 }
 0x14d   : > { %v2708_v27 = vpack.c.bf16 %v1472_v35, %v1465_v47  ;;  %v1485_v11 = vsub.f32 %v3848_v48, %v4349_v43  ;;  %v1598_v4 = vand.u32 4294901760, %v1597_v53  ;;  %v2718_v6 = vpack.c.bf16 %v4493_v33, %v4492_v29 }
 0x14e   : > { %v3990_v3 = vpack.c.bf16 %v1584_v10, %v1577_v23  ;;  %v1479_v18 = vand.u32 4294901760, %v1478_v46  ;;  %v2714_v23 = vpack.c.bf16 %v3667_v60, %v3665_v59  ;;  %v2720_v28 = vpack.c.bf16 %v3688_v32, %v3686_v55 }
 0x14f   : > { %v1486_v19 = vand.u32 4294901760, %v1485_v11  ;;  %v2710_v62 = vpack.c.bf16 %v1598_v4, %v1591_v14  ;;  %v2722_v35 = vpack.c.bf16 %v3696_v45, %v3690_v57  ;;  %v2724_v47 = vpack.c.bf16 %v3700_v2, %v3698_v61 }
 0x150   : > { %v2728_v4 = vpack.c.bf16 %v3716_v16, %v3714_v5  ;;  %v2732_v14 = vpack.c.bf16 %v3815_v40, %v3813_v0  ;;  %v2734_v53 = vpack.c.bf16 %v3819_v50, %v3817_v41  ;;  %v2736_v46 = vpack.c.bf16 %v3824_v25, %v3822_v39  ;;  %v356_v50 = vld [vmem:[%s4221_s2] sm:$0x3] }
 0x151   : > { %v2712_v10 = vpack.c.bf16 %v1486_v19, %v1479_v18  ;;  %v2726_v19 = vpack.c.bf16 %v3712_v36, %v3702_v13  ;;  %v2730_v18 = vpack.c.bf16 %v3809_v38, %v3807_v54  ;;  %v2738_v11 = vpack.c.bf16 %v3828_v63, %v3826_v21 }
 0x152   : > { %v2740_v43 = vpack.c.bf16 %v3833_v9, %v3831_v17  ;;  %v2742_v16 = vpack.c.bf16 %v3841_v22, %v3839_v20  ;;  %v2744_v38 = vpack.c.bf16 %v3848_v48, %v3846_v51  ;;  %v358_v54 = vlaneseq }
 0x154   : > { %v359_v40 = vshrl.u32 %v358_v54, 7 }
 0x156   : > { %v360_v0 = vsub.s32 0, %v359_v40  ;;  %v364_v25 = vsub.s32 1, %v359_v40 }
 0x158   : > { %v361_v39 = vrot.slane %v356_v50, %v360_v0  ;;  %v365_v41 = vrot.slane %v356_v50, %v364_v25  ;;  %v4498_v25 = vld [vmem:[#allocation43_spill] sm:$0xff] }
 0x205   : > { %v1218_v63 = vpop.f32.mrb[0].mxu0 }
 0x206   : > { %v2842_v21 = vadd.f32 %v1218_v63, %v361_v39  ;;  %v1220_v5 = vpop.f32.mrb[1].mxu0  ;;  %v4497_v39 = vld [vmem:[#allocation39_spill] sm:$0xff]  ;;  %v4502_v63 = vld [vmem:[#allocation12_spill] sm:$0xff] }
 0x207   : > { %v2843_v9 = vadd.f32 %v1220_v5, %v365_v41 }
 0x208   : > { %v1223_v17 = vmax.f32 %v2842_v21, 0.0  ;;  %v4501_v21 = vld [vmem:[#allocation28_spill] sm:$0xff] }
 0x209   : > { %v1224_v36 = vmax.f32 %v2843_v9, 0.0  ;;  %v4504_v9 = vld [vmem:[#allocation15_spill] sm:$0xff] }
 0x20a   : > { %v4036_v22 = vand.u32 4294901760, %v1223_v17 }
 0x20b   : > { %v4038_v20 = vand.u32 4294901760, %v1224_v36 }
 0x20c   : > { %v4041_v54 = vsub.f32 %v1223_v17, %v4036_v22  ;;  %v4503_v17 = vld [vmem:[#allocation29_spill] sm:$0xff] }
 0x20d   : > { %v1361_v48 = vsub.f32 %v1224_v36, %v4038_v20  ;;  %v4495_v36 = vld [vmem:[#allocation35_spill] sm:$0xff] }
 0x20e   : > { %v1368_v51 = vand.u32 4294901760, %v4041_v54 }
 0x20f   : > { %v1362_v40 = vand.u32 4294901760, %v1361_v48 }
 0x210   : > { %v1369_v0 = vsub.f32 %v4041_v54, %v1368_v51 }
 0x211   : > { %v1363_v50 = vsub.f32 %v1361_v48, %v1362_v40 }
 0x212   : > { %v1370_v41 = vand.u32 4294901760, %v1369_v0  ;;  %v4538_v0 = vld [vmem:[#allocation20_spill] sm:$0xff] }
 0x213   : > { %v1364_v5 = vand.u32 4294901760, %v1363_v50  ;;  %v4539_v50 = vand.u32 4294901760, %v4538_v0 }
 0x215   : > { %1365 = vmatprep.mubr.f32.mxu1 %v1364_v5  ;;  %v4540_v5 = vld [vmem:[#allocation21_spill] sm:$0xff] }
 0x216   : > { %1371 = vmatmul.mubr.f32.vlgmr.msra.gmra.mrb[0].mxu1 %v1370_v41  ;;  %v4541_v41 = vand.u32 4294901760, %v4540_v5 }
 0x217   : > { %2685 = vmatpush3.bf16.msra.mxu1 %v3886_v44  ;;  %1601 = vmatprep.mubr.f32.mxu1 %v4038_v20 }
 0x218   : > { %2687 = vmatprep.subr.bf16.mxu1 %v3893_v58  ;;  %v4508_v58 = vld [vmem:[#allocation33_spill] sm:$0xff] }
 0x21b   : > { %2689 = vmatpush3.bf16.msra.mxu1 %v3895_v49  ;;  %v4509_v49 = vand.u32 4294901760, %v3669_v31 }
 0x21c   : > { %2691 = vmatprep.subr.bf16.mxu1 %v3910_v30  ;;  %v4510_v30 = vand.u32 4294901760, %v3673_v1  ;;  %v4515_v1 = vand.u32 4294901760, %v3690_v57 }
 0x21f   : > { %2693 = vmatpush3.bf16.msra.mxu1 %v3922_v37  ;;  %v4506_v37 = vand.u32 4294901760, %v3665_v59  ;;  %v4513_v59 = vand.u32 4294901760, %v3686_v55 }
 0x220   : > { %2695 = vmatprep.subr.bf16.mxu1 %v3930_v12  ;;  %v4505_v12 = vld [vmem:[#allocation30_spill] sm:$0xff] }
 0x223   : > { %2697 = vmatpush3.bf16.msra.mxu1 %v3938_v24  ;;  %v2780_v24 = vpack.c.bf16 %v4510_v30, %v4509_v49  ;;  %v4544_v49 = vld [vmem:[#allocation23_spill] sm:$0xff] }
 0x224   : > { %2699 = vmatprep.subr.bf16.mxu1 %v3950_v42  ;;  %v4511_v42 = vand.u32 4294901760, %v4492_v29  ;;  %v4545_v30 = vand.u32 4294901760, %v4544_v49 }
 0x227   : > { %2701 = vmatpush3.bf16.msra.mxu1 %v3958_v8  ;;  %v4512_v8 = vand.u32 4294901760, %v4493_v33  ;;  %v4517_v33 = vand.u32 4294901760, %v3698_v61 }
 0x228   : > { %2703 = vmatprep.subr.bf16.mxu1 %v3970_v52 }
 0x229   : > { %v2782_v52 = vpack.c.bf16 %v4512_v8, %v4511_v42  ;;  %v4546_v42 = vld [vmem:[#allocation24_spill] sm:$0xff] }
 0x22a   : > { %v4547_v8 = vand.u32 4294901760, %v4546_v42 }
 0x22b   : > { %2705 = vmatpush3.bf16.msra.mxu1 %v3978_v34  ;;  %v4516_v34 = vand.u32 4294901760, %v3696_v45  ;;  %v4526_v45 = vld [vmem:[#allocation13_spill] sm:$0xff] }
 0x22c   : > { %2707 = vmatprep.subr.bf16.mxu1 %v3990_v3  ;;  %v4520_v3 = vld [vmem:[#allocation40_spill] sm:$0xff] }
 0x22d   : > { %v2786_v29 = vpack.c.bf16 %v4516_v34, %v4515_v1  ;;  %v4521_v55 = vand.u32 4294901760, %v4520_v3  ;;  %v4552_v34 = vld [vmem:[#allocation32_spill] sm:$0xff] }
 0x22f   : > { %2709 = vmatpush3.bf16.msra.mxu1 %v2708_v27 }
 0x230   : > { %2711 = vmatprep.subr.bf16.mxu1 %v2710_v62  ;;  %v4494_v62 = vld [vmem:[#allocation34_spill] sm:$0xff] }
 0x233   : > { %2713 = vmatpush3.bf16.msra.mxu1 %v2712_v10 }
 0x234   : > { %2715 = vmatprep.subr.bf16.mxu1 %v2714_v23  ;;  %v4524_v23 = vld [vmem:[#allocation42_spill] sm:$0xff] }
 0x235   : > { %v4525_v57 = vand.u32 4294901760, %v4524_v23 }
 0x236   : > { %1603 = vmatmul.mubr.f32.vlgmr.msra.gmra.mrb[2].mxu1 %v4036_v22 }
 0x237   : > { %2717 = vmatpush3.bf16.msra.mxu1 %v2716_v56  ;;  %1738 = vmatprep.mubr.f32.mxu1 %v1361_v48  ;;  %v4507_v48 = vand.u32 4294901760, %v3667_v60  ;;  %v4514_v60 = vand.u32 4294901760, %v3688_v32  ;;  %v4518_v56 = vand.u32 4294901760, %v3700_v2  ;;  %v4522_v32 = vld [vmem:[#allocation41_spill] sm:$0xff]  ;;  %v4530_v2 = vld [vmem:[#allocation16_spill] sm:$0xff] }
 0x238   : > { %2719 = vmatprep.subr.bf16.mxu1 %v2718_v6  ;;  %v4496_v6 = vld [vmem:[#allocation36_spill] sm:$0xff]  ;;  %v4523_v10 = vand.u32 4294901760, %v4522_v32 }
 0x239   : > { %v2778_v44 = vpack.c.bf16 %v4507_v48, %v4506_v37  ;;  %v2784_v31 = vpack.c.bf16 %v4514_v60, %v4513_v59  ;;  %v2800_v37 = vpack.c.bf16 %v4541_v41, %v4539_v50  ;;  %v4542_v48 = vld [vmem:[#allocation22_spill] sm:$0xff] }
 0x23b   : > { %2721 = vmatpush3.bf16.msra.mxu1 %v2720_v28  ;;  %v2792_v28 = vpack.c.bf16 %v4525_v57, %v4523_v10 }
 0x23c   : > { %2723 = vmatprep.subr.bf16.mxu1 %v2722_v35  ;;  %v4527_v35 = vand.u32 4294901760, %v4526_v45 }
 0x23f   : > { %2725 = vmatpush3.bf16.msra.mxu1 %v2724_v47  ;;  %v4528_v47 = vld [vmem:[#allocation14_spill] sm:$0xff] }
 0x240   : > { %2727 = vmatprep.subr.bf16.mxu1 %v2726_v19  ;;  %v4529_v61 = vand.u32 4294901760, %v4528_v47 }
 0x242   : > { %v2794_v19 = vpack.c.bf16 %v4529_v61, %v4527_v35  ;;  %v2926_v35 = vld [vmem:[%s3309_s6] sm:$0xff] }
 0x243   : > { %2729 = vmatpush3.bf16.msra.mxu1 %v2728_v4  ;;  %v4531_v4 = vand.u32 4294901760, %v4530_v2 }
 0x244   : > { %2731 = vmatprep.subr.bf16.mxu1 %v2730_v18  ;;  %v4532_v18 = vld [vmem:[#allocation17_spill] sm:$0xff] }
 0x247   : > { %2733 = vmatpush3.bf16.msra.mxu1 %v2732_v14 }
 0x248   : > { %2735 = vmatprep.subr.bf16.mxu1 %v2734_v53  ;;  %v4534_v53 = vld [vmem:[#allocation18_spill] sm:$0xff] }
 0x24b   : > { %2737 = vmatpush3.bf16.msra.mxu1 %v2736_v46  ;;  %v4535_v46 = vand.u32 4294901760, %v4534_v53 }
 0x24c   : > { %2739 = vmatprep.subr.bf16.mxu1 %v2738_v11  ;;  %v4536_v11 = vld [vmem:[#allocation19_spill] sm:$0xff] }
 0x24f   : > { %2741 = vmatpush3.bf16.msra.mxu1 %v2740_v43  ;;  %v4519_v43 = vand.u32 4294901760, %v3702_v13  ;;  %v4533_v13 = vand.u32 4294901760, %v4532_v18 }
 0x250   : > { %2743 = vmatprep.subr.bf16.mxu1 %v2742_v16  ;;  %v4499_v16 = vld [vmem:[#allocation25_spill] sm:$0xff] }
 0x251   : > { %v2790_v27 = vpack.c.bf16 %v4521_v55, %v4519_v43  ;;  %v2796_v14 = vpack.c.bf16 %v4533_v13, %v4531_v4  ;;  %v4556_v43 = vld [vmem:[#allocation45_spill] sm:$0xff] }
 0x252   : > { %v4557_v3 = vand.u32 4294901760, %v4556_v43 }
 0x253   : > { %2745 = vmatpush3.bf16.msra.mxu1 %v2744_v38  ;;  %v4500_v38 = vld [vmem:[#allocation27_spill] sm:$0xff] }
 0x254   : > { %2747 = vmatprep.subr.bf16.mxu1 %v4494_v62 }
 0x256   : > { %1741 = vmatmul.mubr.f32.vlgmr.msra.gmra.mrb[4].mxu1 %v4041_v54  ;;  %v4537_v54 = vand.u32 4294901760, %v4536_v11 }
 0x257   : > { %2749 = vmatpush3.bf16.msra.mxu1 %v4495_v36  ;;  %1845 = vmatprep.mubr.f32.mxu1 %v1362_v40 }
 0x258   : > { %2751 = vmatprep.subr.bf16.mxu1 %v4496_v6  ;;  %v2798_v40 = vpack.c.bf16 %v4537_v54, %v4535_v46 }
 0x25b   : > { %2753 = vmatpush3.bf16.msra.mxu1 %v3684_v26 }
 0x25c   : > { %2755 = vmatprep.subr.bf16.mxu1 %v3694_v7 }
 0x25f   : > { %2757 = vmatpush3.bf16.msra.mxu1 %v3707_v15 }
 0x260   : > { %2759 = vmatprep.subr.bf16.mxu1 %v4497_v39 }
 0x263   : > { %2761 = vmatpush3.bf16.msra.mxu1 %v4498_v25 }
 0x264   : > { %2763 = vmatprep.subr.bf16.mxu1 %v4499_v16 }
 0x267   : > { %2765 = vmatpush3.bf16.msra.mxu1 %v4500_v38 }
 0x268   : > { %2767 = vmatprep.subr.bf16.mxu1 %v4501_v21 }
 0x26b   : > { %2769 = vmatpush3.bf16.msra.mxu1 %v4502_v63 }
 0x26c   : > { %2771 = vmatprep.subr.bf16.mxu1 %v4503_v17 }
 0x26f   : > { %2773 = vmatpush3.bf16.msra.mxu1 %v4504_v9 }
 0x270   : > { %2775 = vmatprep.subr.bf16.mxu1 %v4505_v12 }
 0x273   : > { %2777 = vmatpush3.bf16.msra.mxu1 %v4508_v58 }
 0x274   : > { %2779 = vmatprep.subr.bf16.mxu1 %v2778_v44  ;;  %v4543_v44 = vand.u32 4294901760, %v4542_v48 }
 0x276   : > { %1849 = vmatmul.mubr.f32.vlgmr.msra.gmra.mrb[6].mxu1 %v1368_v51  ;;  %v2788_v51 = vpack.c.bf16 %v4518_v56, %v4517_v33  ;;  %v4554_v56 = vld [vmem:[#allocation44_spill] sm:$0xff] }
 0x277   : > { %2781 = vmatpush3.bf16.msra.mxu1 %v2780_v24  ;;  %2015 = vmatprep.mubr.f32.mxu1 %v4038_v20  ;;  %v2802_v24 = vpack.c.bf16 %v4545_v30, %v4543_v44 }
 0x278   : > { %2783 = vmatprep.subr.bf16.mxu1 %v2782_v52  ;;  %v4548_v52 = vld [vmem:[#allocation26_spill] sm:$0xff] }
 0x279   : > { %v4549_v59 = vand.u32 4294901760, %v4548_v52 }
 0x27b   : > { %2785 = vmatpush3.bf16.msra.mxu1 %v2784_v31  ;;  %v2804_v60 = vpack.c.bf16 %v4549_v59, %v4547_v8  ;;  %v4550_v31 = vld [vmem:[#allocation31_spill] sm:$0xff] }
 0x27c   : > { %2787 = vmatprep.subr.bf16.mxu1 %v2786_v29  ;;  %v4551_v1 = vand.u32 4294901760, %v4550_v31  ;;  %v4553_v29 = vand.u32 4294901760, %v4552_v34 }
 0x27e   : > { %v2806_v33 = vpack.c.bf16 %v4553_v29, %v4551_v1 }
 0x27f   : > { %2789 = vmatpush3.bf16.msra.mxu1 %v2788_v51  ;;  %v4555_v51 = vand.u32 4294901760, %v4554_v56 }
 0x280   : > { %2791 = vmatprep.subr.bf16.mxu1 %v2790_v27 }
 0x281   : > { %v2808_v55 = vpack.c.bf16 %v4557_v3, %v4555_v51 }
 0x283   : > { %2793 = vmatpush3.bf16.msra.mxu1 %v2792_v28 }
 0x284   : > { %2795 = vmatprep.subr.bf16.mxu1 %v2794_v19 }
 0x287   : > { %2797 = vmatpush3.bf16.msra.mxu1 %v2796_v14 }
 0x288   : > { %2799 = vmatprep.subr.bf16.mxu1 %v2798_v40 }
 0x28b   : > { %2801 = vmatpush3.bf16.msra.mxu1 %v2800_v37 }
 0x28c   : > { %2803 = vmatprep.subr.bf16.mxu1 %v2802_v24 }
 0x28f   : > { %2805 = vmatpush3.bf16.msra.mxu1 %v2804_v60 }
 0x290   : > { %2807 = vmatprep.subr.bf16.mxu1 %v2806_v33 }
 0x293   : > { %2809 = vmatpush3.bf16.msra.mxu1 %v2808_v55 }
 0x294   : > { %2811 = vmatprep.subr.bf16.mxu1 %v4494_v62 }
 0x296   : > { %2017 = vmatmul.mubr.f32.vlgmr.msra.gmra.mrb[8].mxu1 %v4036_v22 }
 0x297   : > { %2813 = vmatpush3.bf16.msra.mxu1 %v4495_v36  ;;  %2119 = vmatprep.mubr.f32.mxu1 %v4038_v20  ;;  %v2243_v20 = vld [vmem:[%s4223_s4] ss:$0 sm:$0xff] }
 0x298   : > { %2815 = vmatprep.subr.bf16.mxu1 %v4496_v6 }
 0x29b   : > { %2817 = vmatpush3.bf16.msra.mxu1 %v3684_v26 }
 0x29c   : > { %2819 = vmatprep.subr.bf16.mxu1 %v3694_v7 }
 0x29f   : > { %2821 = vmatpush3.bf16.msra.mxu1 %v3707_v15 }
 0x2a0   : > { %2823 = vmatprep.subr.bf16.mxu1 %v4497_v39 }
 0x2a3   : > { %2825 = vmatpush3.bf16.msra.mxu1 %v4498_v25 }
 0x2a4   : > { %2827 = vmatprep.subr.bf16.mxu1 %v4499_v16 }
 0x2a7   : > { %2829 = vmatpush3.bf16.msra.mxu1 %v4500_v38 }
 0x2a8   : > { %2831 = vmatprep.subr.bf16.mxu1 %v4501_v21 }
 0x2ab   : > { %2833 = vmatpush3.bf16.msra.mxu1 %v4502_v63 }
 0x2ac   : > { %2835 = vmatprep.subr.bf16.mxu1 %v4503_v17 }
 0x2af   : > { %2837 = vmatpush3.bf16.msra.mxu1 %v4504_v9 }
 0x2b0   : > { %2839 = vmatprep.subr.bf16.mxu1 %v4505_v12 }
 0x2b3   : > { %2841 = vmatpush3.bf16.msra.mxu1 %v4508_v58 }
 0x2b6   : > { %2121 = vmatmul.mubr.f32.vlgmr.msra.gmra.mrb[10].mxu1 %v4036_v22 }
 0x2e9   : > { %v2280_v7 = vpop.f32.mrb[0].mxu1 }
 0x2ea   : > { %v2281_v26 = vpop.f32.mrb[1].mxu1 }
 0x2eb   : > { %v2282_v15 = vadd.f32 %v2281_v26, %v2280_v7 }
 0x2ed   : > { %v1373_v6 = vadd.f32 %v2282_v15, %v2243_v20 }
 0x309   : > { %v2315_v62 = vpop.f32.mrb[2].mxu1 }
 0x30a   : > { %v2316_v36 = vpop.f32.mrb[3].mxu1 }
 0x30b   : > { %v2317_v39 = vadd.f32 %v2316_v36, %v2315_v62 }
 0x30d   : > { %v1605_v25 = vadd.f32 %v2317_v39, %v1373_v6 }
 0x329   : > { %v2350_v16 = vpop.f32.mrb[4].mxu1 }
 0x32a   : > { %v2351_v38 = vpop.f32.mrb[5].mxu1 }
 0x32b   : > { %v2352_v21 = vadd.f32 %v2351_v38, %v2350_v16 }
 0x32d   : > { %v1743_v63 = vadd.f32 %v2352_v21, %v1605_v25 }
 0x349   : > { %v2385_v22 = vpop.f32.mrb[6].mxu1 }
 0x34a   : > { %v2386_v17 = vpop.f32.mrb[7].mxu1 }
 0x34b   : > { %v2387_v9 = vadd.f32 %v2386_v17, %v2385_v22 }
 0x34d   : > { %v1851_v12 = vadd.f32 %v2387_v9, %v1743_v63 }
 0x369   : > { %v2420_v58 = vpop.f32.mrb[8].mxu1 }
 0x36a   : > { %v2421_v27 = vpop.f32.mrb[9].mxu1 }
 0x36b   : > { %v2422_v32 = vadd.f32 %v2421_v27, %v2420_v58 }
 0x36d   : > { %v2019_v10 = vadd.f32 %v2422_v32, %v1851_v12 }
 0x389   : > { %v2455_v23 = vpop.f32.mrb[10].mxu1 }
 0x38a   : > { %v2456_v57 = vpop.f32.mrb[11].mxu1 }
 0x38b   : > { %v2457_v28 = vadd.f32 %v2456_v57, %v2455_v23 }
 0x38d   : > { %v2123_v45 = vadd.f32 %v2457_v28, %v2019_v10 }
 0x38f   : > { %v2126_v47 = vadd.f32 %v2926_v35, %v2123_v45 }
 0x391   : > { %2127 = vst [vmem:[%s322_s19] sm:$0xff] %v2126_v47 }
 0x392   : > { %3026 = shalt.err (!%p3023_p2)
}
 0x393   : > { %s3027_s20 = scalar_lea.hbm %s4175_s14, 128  ;;  %s3031_s30 = scalar_lea.hbm %s4226_s7, 256 }
 0x394   : > { %p3028_p13 = scmp.ne.s32.totalorder %s4175_s14, %s3027_s20  ;;  %p3032_p4 = scmp.lt.u32.totalorder %s4175_s14, %s4226_s7 }
 0x395   : > { %p3033_p7 = scmp.lt.u32.totalorder %s3031_s30, %s3027_s20  ;;  %p3035_p11 = scmp.lt.u32.totalorder %s3027_s20, %s4175_s14 }
 0x396   : > { %p3029_p6 = pnand %p3028_p13, %p4558_p0 }
 0x397   : > { %p3034_p8 = por %p3033_p7, %p3032_p4 }
 0x398   : > { %p3030_p10 = pneg %p3029_p6 }
 0x399   : > { %p3036_p1 = por %p3035_p11, %p3034_p8 }
 0x39b   : > { %p3037_p3 = pnand %p3036_p1, %p3030_p10 }
 0x39d   : > { %3040 = shalt.err (!%p3037_p3)
}
 0x39e   : > { %2864 = dma.vmem_to_hbm [thread:$0]  (%p4558_p0), %s4177_s13, 128, %s4175_s14, %s2129_s15  }
 0x39f PF: > { %s2154_s18 = sand.u32 1, %s3071_s24   ;;  %p4559_p5 = scmp.ne.s32.totalorder %s4370_s29, 0 }
 0x3a0   : > { %p4560_p9 = scmp.ge.s32.totalorder %s3083_s27, 2  ;;  %s2155_s19 = scalar_lea.sflag [#allocation4], %s2154_s18 }
 0x3a2   : > { %p2878_p12 = pnand %p4560_p9, %p4559_p5 }
 0x3a4   : > { %3066 = dma.done.wait (!%p2878_p12), %s2155_s19, 128  }
 0x3a5   : > { %3068 = vsyncadd (!%p2878_p12), %s2155_s19, 4294967168  ;;  %p21_p2 = scmp.ge.s32.totalorder %s3244_s22, 4   ;;  %s4561_s24 = smov %s3075_s25 }
 0x3a6   : > { %s4562_s25 = smov %s3079_s26  ;;  %s4563_s26 = smov %s3253_s8 }
 0x3a7   : > { %s4564_s27 = smov %s3244_s22  ;;  %23 = sbr.rel (!%p21_p2) target bundleno = 6 (0x6), region = 101 }
 0x3ae   :  { %2160 = vsyncpa [#allocation3], 1 }
 0x3af   :  { %2162 = vsyncpa [#allocation3 + $0x1], 1 }
 0x3b0   :  { %2163 = vsyncpa [#allocation6], 1 }
 0x3b1   :  { %2164 = vsyncpa [#allocation4], 1 }
 0x3b2   :  { %2166 = vsyncpa [#allocation4 + $0x1], 1 }

</bundles_post_ra>
